<compile_context>
chip_gen: v5e
topology: v5e:2x2
jax: 0.10.0
libtpu: 0.0.40
codegen_flags: <defaults>
</compile_context>

<pallas_src>
import functools

import numpy as np
import jax
import jax.numpy as jnp
from jax import lax
from jax.experimental import pallas as pl
from jax.experimental.pallas import tpu as pltpu

# ---- Constructor hyperparameters of CondEventLSTM (small, deterministic) ----
VOCAB = {'<PAD>': 0, 'e1': 1, 'e2': 2, 'e3': 3, 'e4': 4, 'e5': 5, 'e6': 6, 'e7': 7, 'e8': 8}
NB_LAYERS = 1                 # TODO(synk): nb_layers > 1 would repeat the recurrence per layer
MEAN_LOG_INTER_TIME = 0.3
STD_LOG_INTER_TIME = 1.7
NB_LSTM_UNITS = 32            # H  (4H = 128 -> one full lane tile for the gate matmuls)
EMBEDDING_DIM = 8             # E
TIME_EMB_DIM = 8              # T
NUM_MIX_COMPONENTS = 16       # M
NUM_LABELS = 10
NB_EVENTS = len(VOCAB) - 1    # 8
D_IN = EMBEDDING_DIM + TIME_EMB_DIM
OUT_W = 16                    # packed output lanes: [8 yhat | 1 loss | 7 undefined]

# MXU operand dtype (perf review: single-pass bf16 on MXU, f32 accumulate + f32 elementwise).
MXU_DTYPE = jnp.bfloat16

# ---- activations slab lane layout: (S*B, 128) f32 ----
ACT_LANES = 128
LANE_X = 0                     # lanes  0:16  LSTM input  (word emb ++ time2vec)
LANE_Y = D_IN                  # lanes 16:24  Y word embeddings
LANE_YD = D_IN + EMBEDDING_DIM  # lane  24    YDelta
LANE_MASK = LANE_YD + 1        # lane  25    length mask
LANE_LABEL = 32                # lanes 32:40, rows[:B]  conditional label embeddings

# ---- weight slab row layout: (W_ROWS, 128) bf16, all segments at lane offset 0 ----
ROW_W_IH = 0      # 16 rows, lanes 0:128
ROW_W_HH = 16     # 32 rows, lanes 0:128
ROW_W_FC = 48     # 8  rows, lanes 0:64   [fc_h | fc_c]
ROW_W_HE = 64     # 32 rows, lanes 0:8
ROW_W_HTX = 96    # 32 rows, lanes 0:8
ROW_W_HTY = 128   # 8  rows, lanes 0:8
ROW_W_MIX = 144   # 8  rows, lanes 0:48   [loc | log_scale | log_weight]
W_ROWS = 160

_LOG_2PI = float(np.log(2.0 * np.pi))
_LOG_STD = float(np.log(STD_LOG_INTER_TIME))


# --------------------------------------------------------------- fused kernel
def fused_kernel(acts_ref, wts_ref, bias_ref, out_ref, *, S, B):
    """acts rows are time-major flattened: row = t*B + b."""
    H = NB_LSTM_UNITS
    E = EMBEDDING_DIM
    M = NUM_MIX_COMPONENTS

    acts = acts_ref[...]                                                    # (S*B, 128) f32
    wts = wts_ref[...]                                                      # (160, 128) bf16
    bias = bias_ref[...]                                                    # (8, 128)  f32

    x = acts[:, LANE_X:LANE_X + D_IN].astype(MXU_DTYPE)                     # (S*B, 16)
    y = acts[:, LANE_Y:LANE_Y + E]                                          # (S*B, 8)  f32
    yd = acts[:, LANE_YD:LANE_YD + 1]                                       # (S*B, 1)
    mask = acts[:, LANE_MASK:LANE_MASK + 1]                                 # (S*B, 1)
    label = acts[:B, LANE_LABEL:LANE_LABEL + E].astype(MXU_DTYPE)           # (B, 8)

    w_ih = wts[ROW_W_IH:ROW_W_IH + D_IN, :]                                 # (16, 128)
    w_hh = wts[ROW_W_HH:ROW_W_HH + H, :]                                    # (32, 128)
    w_fc = wts[ROW_W_FC:ROW_W_FC + E, :2 * H]                               # (8, 64)
    w_he = wts[ROW_W_HE:ROW_W_HE + H, :NB_EVENTS]                           # (32, 8)
    w_htx = wts[ROW_W_HTX:ROW_W_HTX + H, :E]                                # (32, 8)
    w_hty = wts[ROW_W_HTY:ROW_W_HTY + E, :E]                                # (8, 8)
    w_mix = wts[ROW_W_MIX:ROW_W_MIX + E, :3 * M]                            # (8, 48)

    b_g = bias[0:1, :]                                                      # (1, 128)
    b_fc = bias[1:2, :2 * H]                                                # (1, 64)
    b_he = bias[2:3, :NB_EVENTS]                                            # (1, 8)
    b_ht = bias[3:4, :E]                                                    # (1, 8)
    b_mix = bias[4:5, :3 * M]                                               # (1, 48)

    # ---- Hoisted input projection: one MXU op covers every timestep ----
    xproj = jnp.dot(x, w_ih, preferred_element_type=jnp.float32) + b_g      # (S*B, 4H) f32

    # init_hidden: merged fc_h|fc_c -> one matmul, slice h0 / c0   (nb_layers = 1)
    hc0 = jnp.dot(label, w_fc, preferred_element_type=jnp.float32) + b_fc   # (B, 2H)
    h = hc0[:, :H]
    c = hc0[:, H:2 * H]

    # ---- Fully unrolled recurrence (S is a small static trip count) ----
    # TODO(synk): hold w_hh resident in the MXU across the unrolled steps via
    # pltpu.matmul_push_rhs / matmul_acc_lhs / matmul_pop once that explicit path is
    # validated; for now rely on Mosaic scheduling + single-pass bf16 pushes.
    hs_steps = []
    for t in range(S):
        gates = xproj[t * B:(t + 1) * B, :] + jnp.dot(
            h.astype(MXU_DTYPE), w_hh, preferred_element_type=jnp.float32)  # (B, 4H) f32
        sg = jax.nn.sigmoid(gates)            # full-vreg EUP pass -> i, f, o
        th = jnp.tanh(gates)                  # full-vreg EUP pass -> g
        c = sg[:, H:2 * H] * c + sg[:, 0:H] * th[:, 2 * H:3 * H]
        h = sg[:, 3 * H:4 * H] * jnp.tanh(c)
        hs_steps.append(h)
    # pack/pad_packed_sequence semantics: emitted outputs past X_lengths are zero.
    hs = jnp.concatenate(hs_steps, axis=0) * mask                           # (S*B, H)

    # ---- Events head ----
    yhat = jnp.dot(hs.astype(MXU_DTYPE), w_he,
                   preferred_element_type=jnp.float32) + b_he               # (S*B, 8)

    # ---- Time-context head (no lane concat): sigmoid distributes elementwise ----
    sh = jax.nn.sigmoid(hs).astype(MXU_DTYPE)
    sy = jax.nn.sigmoid(y).astype(MXU_DTYPE)
    ctx = jax.nn.sigmoid(
        jnp.dot(sh, w_htx, preferred_element_type=jnp.float32)
        + jnp.dot(sy, w_hty, preferred_element_type=jnp.float32) + b_ht)    # (S*B, 8) f32

    # ---- LogNormMix: single merged projection -> (loc | log_scale | log_weight) ----
    raw = jnp.dot(ctx.astype(MXU_DTYPE), w_mix,
                  preferred_element_type=jnp.float32) + b_mix               # (S*B, 3M)
    locs = raw[:, 0:M]
    log_scales = jnp.clip(raw[:, M:2 * M], -5.0, 3.0)
    lw = raw[:, 2 * M:3 * M]
    mmax = jnp.max(lw, axis=-1, keepdims=True)
    log_w = lw - (mmax + jnp.log(jnp.sum(jnp.exp(lw - mmax), axis=-1, keepdims=True)))

    # LogNormalMixtureDistribution.log_prob(YDelta.clamp(1e-10))
    yd_c = jnp.maximum(yd, 1e-10)
    logz = jnp.log(yd_c)
    xv = (logz - MEAN_LOG_INTER_TIME) * (1.0 / STD_LOG_INTER_TIME)          # inverse Affine∘Exp
    inv_scale = jnp.exp(-log_scales)
    comp_lp = -0.5 * jnp.square((xv - locs) * inv_scale) - log_scales - 0.5 * _LOG_2PI
    s = log_w + comp_lp
    m2 = jnp.max(s, axis=-1, keepdims=True)
    gmm_lp = m2 + jnp.log(jnp.sum(jnp.exp(s - m2), axis=-1, keepdims=True))
    loss = gmm_lp - logz - _LOG_STD                                         # (S*B, 1)

    # ---- Sliced stores (no output concat). Lanes 9:16 are never read downstream. ----
    out_ref[:, 0:NB_EVENTS] = yhat
    out_ref[:, NB_EVENTS:NB_EVENTS + 1] = loss


# --------------------------------------------------------- slab builders / wrapper
def _build_weight_slab(p):
    H, E, M = NB_LSTM_UNITS, EMBEDDING_DIM, NUM_MIX_COMPONENTS
    w = jnp.zeros((W_ROWS, 128), jnp.float32)
    w = w.at[ROW_W_IH:ROW_W_IH + D_IN, :].set(p['w_ih'])
    w = w.at[ROW_W_HH:ROW_W_HH + H, :].set(p['w_hh'])
    w = w.at[ROW_W_FC:ROW_W_FC + E, :2 * H].set(
        jnp.concatenate([p['w_fch'], p['w_fcc']], axis=1))
    w = w.at[ROW_W_HE:ROW_W_HE + H, :NB_EVENTS].set(p['w_he'])
    w = w.at[ROW_W_HTX:ROW_W_HTX + H, :E].set(p['w_ht_x'])
    w = w.at[ROW_W_HTY:ROW_W_HTY + E, :E].set(p['w_ht_y'])
    w = w.at[ROW_W_MIX:ROW_W_MIX + E, :3 * M].set(
        jnp.concatenate([p['w_loc'], p['w_ls'], p['w_lw']], axis=1))
    return w.astype(MXU_DTYPE)


def _build_bias_slab(p):
    H, E, M = NB_LSTM_UNITS, EMBEDDING_DIM, NUM_MIX_COMPONENTS
    b = jnp.zeros((8, 128), jnp.float32)
    b = b.at[0, :].set(p['b_g'][0])
    b = b.at[1, :2 * H].set(jnp.concatenate([p['b_fch'], p['b_fcc']], axis=1)[0])
    b = b.at[2, :NB_EVENTS].set(p['b_he'][0])
    b = b.at[3, :E].set(p['b_ht'][0])
    b = b.at[4, :3 * M].set(jnp.concatenate([p['b_loc'], p['b_ls'], p['b_lw']], axis=1)[0])
    return b


def fused_pallas(acts, wts, bias, *, S, B):
    vmem = pl.BlockSpec(memory_space=pltpu.MemorySpace.VMEM)
    kernel = functools.partial(fused_kernel, S=S, B=B)
    # TODO(synk): for batch-scaled inputs add a batch-tile grid with
    # dimension_semantics=("parallel",) to use v7x's 2nd TensorCore, and re-derive tile
    # sizes against v7x's 64 MiB (physical) / 32 MiB (scoped) VMEM, not v6e's 128 MiB.
    return pl.pallas_call(
        kernel,
        out_shape=jax.ShapeDtypeStruct((S * B, OUT_W), jnp.float32),
        in_specs=[vmem, vmem, vmem],
        out_specs=vmem,
    )(acts, wts, bias)


def time2vec(Xt, p):
    tau = Xt[..., None].astype(jnp.float32)
    tau_ap = tau * p['t2v_wa'] + p['t2v_ba']
    tau_p = jnp.sin(tau * p['t2v_wp'] + p['t2v_bp'])
    return jnp.concatenate([tau_ap, tau_p], axis=-1) * p['t2v_W']


def cond_event_lstm_forward(p, X, Y, Xt, Yt, XDelta, YDelta, seq_labels, X_lengths, mask):
    del Yt, XDelta, mask  # unused by the PyTorch forward
    B, S = X.shape
    x_emb = p['word_emb'][X]                                                # (B,S,E)
    y_emb = p['word_emb'][Y]                                                # (B,S,E)
    xt_emb = time2vec(Xt, p)                                                # (B,S,T)
    lstm_in = jnp.concatenate([x_emb, xt_emb], axis=-1)                     # (B,S,D_in)
    label_embs = p['cond_emb'][seq_labels]                                  # (B,E)

    # Everything the kernel consumes is time-major flattened: row = t*B + b,
    # packed into a single lane-dense (S*B, 128) activations slab.
    x_tm = jnp.transpose(lstm_in, (1, 0, 2)).reshape(S * B, D_IN)
    y_tm = jnp.transpose(y_emb, (1, 0, 2)).reshape(S * B, EMBEDDING_DIM)
    yd_tm = jnp.transpose(YDelta, (1, 0)).reshape(S * B).astype(jnp.float32)
    # pack_padded_sequence semantics -> zero outputs past X_lengths
    mask_tm = (jnp.arange(S)[:, None] < X_lengths[None, :]).astype(jnp.float32).reshape(S * B)

    acts = jnp.zeros((S * B, ACT_LANES), jnp.float32)
    acts = acts.at[:, LANE_X:LANE_X + D_IN].set(x_tm)
    acts = acts.at[:, LANE_Y:LANE_Y + EMBEDDING_DIM].set(y_tm)
    acts = acts.at[:, LANE_YD].set(yd_tm)
    acts = acts.at[:, LANE_MASK].set(mask_tm)
    acts = acts.at[:B, LANE_LABEL:LANE_LABEL + EMBEDDING_DIM].set(label_embs)

    wts = _build_weight_slab(p)
    bias = _build_bias_slab(p)

    out = fused_pallas(acts, wts, bias, S=S, B=B)                            # (S*B, OUT_W)
    out = jnp.transpose(out.reshape(S, B, OUT_W), (1, 0, 2))                 # (B, S, OUT_W)
    y_hat = out[..., :NB_EVENTS]                                             # (B, S, 8)
    loss = out[..., NB_EVENTS]                                               # (B, S)
    return y_hat, loss


# ------------------------------------------------------------------ parameters
def init_params(key):
    ks = jax.random.split(key, 26)

    def rn(k, shape, scale=0.2):
        return scale * jax.random.normal(k, shape, dtype=jnp.float32)

    word_emb = rn(ks[0], (len(VOCAB), EMBEDDING_DIM)).at[0].set(0.0)        # padding_idx
    cond_emb = rn(ks[1], (NUM_LABELS + 1, EMBEDDING_DIM)).at[0].set(0.0)    # padding_idx
    return dict(
        word_emb=word_emb, cond_emb=cond_emb,
        # Time2Vec
        t2v_wa=rn(ks[2], (1,)), t2v_ba=rn(ks[3], (1,)),
        t2v_wp=rn(ks[4], (TIME_EMB_DIM - 1,)), t2v_bp=rn(ks[5], (TIME_EMB_DIM - 1,)),
        t2v_W=rn(ks[6], (TIME_EMB_DIM,), 1.0),
        # fc_h / fc_c
        w_fch=rn(ks[7], (EMBEDDING_DIM, NB_LSTM_UNITS)), b_fch=rn(ks[8], (1, NB_LSTM_UNITS)),
        w_fcc=rn(ks[9], (EMBEDDING_DIM, NB_LSTM_UNITS)), b_fcc=rn(ks[10], (1, NB_LSTM_UNITS)),
        # LSTM (PyTorch gate order i,f,g,o); bias = b_ih + b_hh folded together
        w_ih=rn(ks[11], (D_IN, 4 * NB_LSTM_UNITS)),
        w_hh=rn(ks[12], (NB_LSTM_UNITS, 4 * NB_LSTM_UNITS)),
        b_g=rn(ks[13], (1, 4 * NB_LSTM_UNITS)),
        # hidden_to_events
        w_he=rn(ks[14], (NB_LSTM_UNITS, NB_EVENTS)), b_he=rn(ks[15], (1, NB_EVENTS)),
        # hidden_to_hidden_time (Linear(H+E, E) split into [H] and [E] row blocks)
        w_ht_x=rn(ks[16], (NB_LSTM_UNITS, EMBEDDING_DIM)),
        w_ht_y=rn(ks[17], (EMBEDDING_DIM, EMBEDDING_DIM)),
        b_ht=rn(ks[18], (1, EMBEDDING_DIM)),
        # LogNormMix.linear (Linear(E, 3M) split into loc / log_scale / log_weight blocks)
        w_loc=rn(ks[19], (EMBEDDING_DIM, NUM_MIX_COMPONENTS)), b_loc=rn(ks[20], (1, NUM_MIX_COMPONENTS)),
        w_ls=rn(ks[21], (EMBEDDING_DIM, NUM_MIX_COMPONENTS)), b_ls=rn(ks[22], (1, NUM_MIX_COMPONENTS)),
        w_lw=rn(ks[23], (EMBEDDING_DIM, NUM_MIX_COMPONENTS)), b_lw=rn(ks[24], (1, NUM_MIX_COMPONENTS)),
    )


# ------------------------------------------------------------------ pure-JAX f32 reference
def reference_forward(p, X, Y, Xt, YDelta, seq_labels, X_lengths):
    from jax.scipy.special import logsumexp
    B, S = X.shape
    H = NB_LSTM_UNITS
    x_emb = p['word_emb'][X]
    y_emb = p['word_emb'][Y]
    inp = jnp.concatenate([x_emb, time2vec(Xt, p)], axis=-1)
    lab = p['cond_emb'][seq_labels]
    h0 = lab @ p['w_fch'] + p['b_fch']
    c0 = lab @ p['w_fcc'] + p['b_fcc']

    def step(carry, x_t):
        h, c = carry
        g = x_t @ p['w_ih'] + h @ p['w_hh'] + p['b_g']
        i = jax.nn.sigmoid(g[:, :H]); f = jax.nn.sigmoid(g[:, H:2 * H])
        gg = jnp.tanh(g[:, 2 * H:3 * H]); o = jax.nn.sigmoid(g[:, 3 * H:])
        c = f * c + i * gg
        h = o * jnp.tanh(c)
        return (h, c), h

    _, hs = lax.scan(step, (h0, c0), jnp.transpose(inp, (1, 0, 2)))
    hs = jnp.transpose(hs, (1, 0, 2))
    hs = hs * (jnp.arange(S)[None, :] < X_lengths[:, None])[..., None]

    xf = hs.reshape(B * S, H)
    yf = y_emb.reshape(B * S, EMBEDDING_DIM)
    yhat = (xf @ p['w_he'] + p['b_he']).reshape(B, S, NB_EVENTS)
    z = jax.nn.sigmoid(jnp.concatenate([xf, yf], axis=-1))
    w_ht = jnp.concatenate([p['w_ht_x'], p['w_ht_y']], axis=0)
    ctx = jax.nn.sigmoid(z @ w_ht + p['b_ht'])
    locs = ctx @ p['w_loc'] + p['b_loc']
    log_scales = jnp.clip(ctx @ p['w_ls'] + p['b_ls'], -5.0, 3.0)
    log_w = jax.nn.log_softmax(ctx @ p['w_lw'] + p['b_lw'], axis=-1)
    yd = jnp.maximum(YDelta.reshape(B * S, 1), 1e-10)
    logz = jnp.log(yd)
    xv = (logz - MEAN_LOG_INTER_TIME) / STD_LOG_INTER_TIME
    comp = -0.5 * ((xv - locs) / jnp.exp(log_scales)) ** 2 - log_scales - 0.5 * _LOG_2PI
    gmm = logsumexp(log_w + comp, axis=-1, keepdims=True)
    loss = gmm - logz - _LOG_STD
    return yhat, loss.reshape(B, S)


# ------------------------------------------------------------------ main
if __name__ == "__main__":
    params = init_params(jax.random.PRNGKey(42))

    B, S = 8, 8
    key = jax.random.PRNGKey(0)
    k1, k2, k3, k4, k5, k6 = jax.random.split(key, 6)
    X = jax.random.randint(k1, (B, S), 1, len(VOCAB))
    Y = jax.random.randint(k2, (B, S), 1, len(VOCAB))
    Xt = jax.random.uniform(k3, (B, S), minval=0.1, maxval=2.0)
    Yt = jax.random.uniform(k4, (B, S), minval=0.1, maxval=2.0)
    XDelta = Xt
    YDelta = jax.random.uniform(k5, (B, S), minval=0.0, maxval=1.5)
    seq_labels = jax.random.randint(k6, (B,), 1, NUM_LABELS + 1)
    X_lengths = jnp.array([8, 6, 8, 3, 5, 8, 7, 2], dtype=jnp.int32)
    mask_arg = (jnp.arange(S)[None, :] < X_lengths[:, None]).astype(jnp.float32)

    fwd = jax.jit(cond_event_lstm_forward)
    y_hat, inter_time_log_loss = fwd(
        params, X, Y, Xt, Yt, XDelta, YDelta, seq_labels, X_lengths, mask_arg)
    jax.block_until_ready((y_hat, inter_time_log_loss))

    y_hat_ref, loss_ref = reference_forward(params, X, Y, Xt, YDelta, seq_labels, X_lengths)
    # bf16 MXU operands (perf review) loosen agreement vs. the f32 reference; with
    # MXU_DTYPE = jnp.float32 the kernel matches the reference to <1e-3.
    TOL = 5e-2 if MXU_DTYPE == jnp.bfloat16 else 1e-3
    np.testing.assert_allclose(np.asarray(y_hat), np.asarray(y_hat_ref), atol=TOL, rtol=TOL)
    np.testing.assert_allclose(np.asarray(inter_time_log_loss), np.asarray(loss_ref),
                               atol=TOL, rtol=TOL)
    print("KERNEL_OK")
</pallas_src>

<mosaic_0001>
module attributes {stable_mosaic.version = 11 : i64} {
  func.func @fused_kernel(%arg0: memref<64x128xf32, #tpu.memory_space<vmem>>, %arg1: memref<160x128xbf16, #tpu.memory_space<vmem>>, %arg2: memref<8x128xf32, #tpu.memory_space<vmem>>, %arg3: memref<64x16xf32, #tpu.memory_space<vmem>>) attributes {dimension_semantics = [], scalar_prefetch = 0 : i64, scratch_operands = 0 : i64, tpu.core_type = #tpu.core_type<tc>} {
    %c0 = arith.constant 0 : index
    %c0_0 = arith.constant 0 : index
    %0 = vector.load %arg0[%c0, %c0_0] : memref<64x128xf32, #tpu.memory_space<vmem>>, vector<64x128xf32>
    %c0_1 = arith.constant 0 : index
    %c0_2 = arith.constant 0 : index
    %1 = vector.load %arg1[%c0_1, %c0_2] : memref<160x128xbf16, #tpu.memory_space<vmem>>, vector<160x128xbf16>
    %c0_3 = arith.constant 0 : index
    %c0_4 = arith.constant 0 : index
    %2 = vector.load %arg2[%c0_3, %c0_4] : memref<8x128xf32, #tpu.memory_space<vmem>>, vector<8x128xf32>
    %3 = vector.extract_strided_slice %0 {offsets = [0, 0], sizes = [64, 16], strides = [1, 1]} : vector<64x128xf32> to vector<64x16xf32>
    %4 = arith.truncf %3 : vector<64x16xf32> to vector<64x16xbf16>
    %5 = vector.extract_strided_slice %0 {offsets = [0, 16], sizes = [64, 8], strides = [1, 1]} : vector<64x128xf32> to vector<64x8xf32>
    %6 = vector.extract_strided_slice %0 {offsets = [0, 24], sizes = [64, 1], strides = [1, 1]} : vector<64x128xf32> to vector<64x1xf32>
    %7 = vector.extract_strided_slice %0 {offsets = [0, 25], sizes = [64, 1], strides = [1, 1]} : vector<64x128xf32> to vector<64x1xf32>
    %8 = vector.extract_strided_slice %0 {offsets = [0, 32], sizes = [8, 8], strides = [1, 1]} : vector<64x128xf32> to vector<8x8xf32>
    %9 = arith.truncf %8 : vector<8x8xf32> to vector<8x8xbf16>
    %10 = vector.extract_strided_slice %1 {offsets = [0, 0], sizes = [16, 128], strides = [1, 1]} : vector<160x128xbf16> to vector<16x128xbf16>
    %11 = vector.extract_strided_slice %1 {offsets = [16, 0], sizes = [32, 128], strides = [1, 1]} : vector<160x128xbf16> to vector<32x128xbf16>
    %12 = vector.extract_strided_slice %1 {offsets = [48, 0], sizes = [8, 64], strides = [1, 1]} : vector<160x128xbf16> to vector<8x64xbf16>
    %13 = vector.extract_strided_slice %1 {offsets = [64, 0], sizes = [32, 8], strides = [1, 1]} : vector<160x128xbf16> to vector<32x8xbf16>
    %14 = vector.extract_strided_slice %1 {offsets = [96, 0], sizes = [32, 8], strides = [1, 1]} : vector<160x128xbf16> to vector<32x8xbf16>
    %15 = vector.extract_strided_slice %1 {offsets = [128, 0], sizes = [8, 8], strides = [1, 1]} : vector<160x128xbf16> to vector<8x8xbf16>
    %16 = vector.extract_strided_slice %1 {offsets = [144, 0], sizes = [8, 48], strides = [1, 1]} : vector<160x128xbf16> to vector<8x48xbf16>
    %17 = vector.extract_strided_slice %2 {offsets = [0, 0], sizes = [1, 128], strides = [1, 1]} : vector<8x128xf32> to vector<1x128xf32>
    %18 = vector.extract_strided_slice %2 {offsets = [1, 0], sizes = [1, 64], strides = [1, 1]} : vector<8x128xf32> to vector<1x64xf32>
    %19 = vector.extract_strided_slice %2 {offsets = [2, 0], sizes = [1, 8], strides = [1, 1]} : vector<8x128xf32> to vector<1x8xf32>
    %20 = vector.extract_strided_slice %2 {offsets = [3, 0], sizes = [1, 8], strides = [1, 1]} : vector<8x128xf32> to vector<1x8xf32>
    %21 = vector.extract_strided_slice %2 {offsets = [4, 0], sizes = [1, 48], strides = [1, 1]} : vector<8x128xf32> to vector<1x48xf32>
    %cst = arith.constant dense<0.000000e+00> : vector<64x128xf32>
    %22 = tpu.matmul %4, %10, %cst {dimension_numbers = #tpu.dot_dimension_numbers<[1], [0], [0], [1], [0, 0, 1, 1], [], []>} : vector<64x16xbf16>, vector<16x128xbf16>, vector<64x128xf32> -> vector<64x128xf32>
    %23 = vector.broadcast %17 : vector<1x128xf32> to vector<64x128xf32>
    %24 = arith.addf %22, %23 : vector<64x128xf32>
    %cst_5 = arith.constant dense<0.000000e+00> : vector<8x64xf32>
    %25 = tpu.matmul %9, %12, %cst_5 {dimension_numbers = #tpu.dot_dimension_numbers<[1], [0], [0], [1], [0, 0, 1, 1], [], []>} : vector<8x8xbf16>, vector<8x64xbf16>, vector<8x64xf32> -> vector<8x64xf32>
    %26 = vector.broadcast %18 : vector<1x64xf32> to vector<8x64xf32>
    %27 = arith.addf %25, %26 : vector<8x64xf32>
    %28 = vector.extract_strided_slice %27 {offsets = [0, 0], sizes = [8, 32], strides = [1, 1]} : vector<8x64xf32> to vector<8x32xf32>
    %29 = vector.extract_strided_slice %27 {offsets = [0, 32], sizes = [8, 32], strides = [1, 1]} : vector<8x64xf32> to vector<8x32xf32>
    %30 = vector.extract_strided_slice %24 {offsets = [0, 0], sizes = [8, 128], strides = [1, 1]} : vector<64x128xf32> to vector<8x128xf32>
    %31 = arith.truncf %28 : vector<8x32xf32> to vector<8x32xbf16>
    %cst_6 = arith.constant dense<0.000000e+00> : vector<8x128xf32>
    %32 = tpu.matmul %31, %11, %cst_6 {dimension_numbers = #tpu.dot_dimension_numbers<[1], [0], [0], [1], [0, 0, 1, 1], [], []>} : vector<8x32xbf16>, vector<32x128xbf16>, vector<8x128xf32> -> vector<8x128xf32>
    %33 = arith.addf %30, %32 : vector<8x128xf32>
    %34 = arith.negf %33 : vector<8x128xf32>
    %35 = math.exp %34 : vector<8x128xf32>
    %cst_7 = arith.constant 1.000000e+00 : f32
    %36 = vector.broadcast %cst_7 : f32 to vector<8x128xf32>
    %37 = arith.addf %36, %35 : vector<8x128xf32>
    %38 = arith.divf %36, %37 : vector<8x128xf32>
    %39 = math.tanh %33 : vector<8x128xf32>
    %40 = vector.extract_strided_slice %38 {offsets = [0, 32], sizes = [8, 32], strides = [1, 1]} : vector<8x128xf32> to vector<8x32xf32>
    %41 = arith.mulf %40, %29 : vector<8x32xf32>
    %42 = vector.extract_strided_slice %38 {offsets = [0, 0], sizes = [8, 32], strides = [1, 1]} : vector<8x128xf32> to vector<8x32xf32>
    %43 = vector.extract_strided_slice %39 {offsets = [0, 64], sizes = [8, 32], strides = [1, 1]} : vector<8x128xf32> to vector<8x32xf32>
    %44 = arith.mulf %42, %43 : vector<8x32xf32>
    %45 = arith.addf %41, %44 : vector<8x32xf32>
    %46 = vector.extract_strided_slice %38 {offsets = [0, 96], sizes = [8, 32], strides = [1, 1]} : vector<8x128xf32> to vector<8x32xf32>
    %47 = math.tanh %45 : vector<8x32xf32>
    %48 = arith.mulf %46, %47 : vector<8x32xf32>
    %49 = vector.extract_strided_slice %24 {offsets = [8, 0], sizes = [8, 128], strides = [1, 1]} : vector<64x128xf32> to vector<8x128xf32>
    %50 = arith.truncf %48 : vector<8x32xf32> to vector<8x32xbf16>
    %cst_8 = arith.constant dense<0.000000e+00> : vector<8x128xf32>
    %51 = tpu.matmul %50, %11, %cst_8 {dimension_numbers = #tpu.dot_dimension_numbers<[1], [0], [0], [1], [0, 0, 1, 1], [], []>} : vector<8x32xbf16>, vector<32x128xbf16>, vector<8x128xf32> -> vector<8x128xf32>
    %52 = arith.addf %49, %51 : vector<8x128xf32>
    %53 = arith.negf %52 : vector<8x128xf32>
    %54 = math.exp %53 : vector<8x128xf32>
    %cst_9 = arith.constant 1.000000e+00 : f32
    %55 = vector.broadcast %cst_9 : f32 to vector<8x128xf32>
    %56 = arith.addf %55, %54 : vector<8x128xf32>
    %57 = arith.divf %55, %56 : vector<8x128xf32>
    %58 = math.tanh %52 : vector<8x128xf32>
    %59 = vector.extract_strided_slice %57 {offsets = [0, 32], sizes = [8, 32], strides = [1, 1]} : vector<8x128xf32> to vector<8x32xf32>
    %60 = arith.mulf %59, %45 : vector<8x32xf32>
    %61 = vector.extract_strided_slice %57 {offsets = [0, 0], sizes = [8, 32], strides = [1, 1]} : vector<8x128xf32> to vector<8x32xf32>
    %62 = vector.extract_strided_slice %58 {offsets = [0, 64], sizes = [8, 32], strides = [1, 1]} : vector<8x128xf32> to vector<8x32xf32>
    %63 = arith.mulf %61, %62 : vector<8x32xf32>
    %64 = arith.addf %60, %63 : vector<8x32xf32>
    %65 = vector.extract_strided_slice %57 {offsets = [0, 96], sizes = [8, 32], strides = [1, 1]} : vector<8x128xf32> to vector<8x32xf32>
    %66 = math.tanh %64 : vector<8x32xf32>
    %67 = arith.mulf %65, %66 : vector<8x32xf32>
    %68 = vector.extract_strided_slice %24 {offsets = [16, 0], sizes = [8, 128], strides = [1, 1]} : vector<64x128xf32> to vector<8x128xf32>
    %69 = arith.truncf %67 : vector<8x32xf32> to vector<8x32xbf16>
    %cst_10 = arith.constant dense<0.000000e+00> : vector<8x128xf32>
    %70 = tpu.matmul %69, %11, %cst_10 {dimension_numbers = #tpu.dot_dimension_numbers<[1], [0], [0], [1], [0, 0, 1, 1], [], []>} : vector<8x32xbf16>, vector<32x128xbf16>, vector<8x128xf32> -> vector<8x128xf32>
    %71 = arith.addf %68, %70 : vector<8x128xf32>
    %72 = arith.negf %71 : vector<8x128xf32>
    %73 = math.exp %72 : vector<8x128xf32>
    %cst_11 = arith.constant 1.000000e+00 : f32
    %74 = vector.broadcast %cst_11 : f32 to vector<8x128xf32>
    %75 = arith.addf %74, %73 : vector<8x128xf32>
    %76 = arith.divf %74, %75 : vector<8x128xf32>
    %77 = math.tanh %71 : vector<8x128xf32>
    %78 = vector.extract_strided_slice %76 {offsets = [0, 32], sizes = [8, 32], strides = [1, 1]} : vector<8x128xf32> to vector<8x32xf32>
    %79 = arith.mulf %78, %64 : vector<8x32xf32>
    %80 = vector.extract_strided_slice %76 {offsets = [0, 0], sizes = [8, 32], strides = [1, 1]} : vector<8x128xf32> to vector<8x32xf32>
    %81 = vector.extract_strided_slice %77 {offsets = [0, 64], sizes = [8, 32], strides = [1, 1]} : vector<8x128xf32> to vector<8x32xf32>
    %82 = arith.mulf %80, %81 : vector<8x32xf32>
    %83 = arith.addf %79, %82 : vector<8x32xf32>
    %84 = vector.extract_strided_slice %76 {offsets = [0, 96], sizes = [8, 32], strides = [1, 1]} : vector<8x128xf32> to vector<8x32xf32>
    %85 = math.tanh %83 : vector<8x32xf32>
    %86 = arith.mulf %84, %85 : vector<8x32xf32>
    %87 = vector.extract_strided_slice %24 {offsets = [24, 0], sizes = [8, 128], strides = [1, 1]} : vector<64x128xf32> to vector<8x128xf32>
    %88 = arith.truncf %86 : vector<8x32xf32> to vector<8x32xbf16>
    %cst_12 = arith.constant dense<0.000000e+00> : vector<8x128xf32>
    %89 = tpu.matmul %88, %11, %cst_12 {dimension_numbers = #tpu.dot_dimension_numbers<[1], [0], [0], [1], [0, 0, 1, 1], [], []>} : vector<8x32xbf16>, vector<32x128xbf16>, vector<8x128xf32> -> vector<8x128xf32>
    %90 = arith.addf %87, %89 : vector<8x128xf32>
    %91 = arith.negf %90 : vector<8x128xf32>
    %92 = math.exp %91 : vector<8x128xf32>
    %cst_13 = arith.constant 1.000000e+00 : f32
    %93 = vector.broadcast %cst_13 : f32 to vector<8x128xf32>
    %94 = arith.addf %93, %92 : vector<8x128xf32>
    %95 = arith.divf %93, %94 : vector<8x128xf32>
    %96 = math.tanh %90 : vector<8x128xf32>
    %97 = vector.extract_strided_slice %95 {offsets = [0, 32], sizes = [8, 32], strides = [1, 1]} : vector<8x128xf32> to vector<8x32xf32>
    %98 = arith.mulf %97, %83 : vector<8x32xf32>
    %99 = vector.extract_strided_slice %95 {offsets = [0, 0], sizes = [8, 32], strides = [1, 1]} : vector<8x128xf32> to vector<8x32xf32>
    %100 = vector.extract_strided_slice %96 {offsets = [0, 64], sizes = [8, 32], strides = [1, 1]} : vector<8x128xf32> to vector<8x32xf32>
    %101 = arith.mulf %99, %100 : vector<8x32xf32>
    %102 = arith.addf %98, %101 : vector<8x32xf32>
    %103 = vector.extract_strided_slice %95 {offsets = [0, 96], sizes = [8, 32], strides = [1, 1]} : vector<8x128xf32> to vector<8x32xf32>
    %104 = math.tanh %102 : vector<8x32xf32>
    %105 = arith.mulf %103, %104 : vector<8x32xf32>
    %106 = vector.extract_strided_slice %24 {offsets = [32, 0], sizes = [8, 128], strides = [1, 1]} : vector<64x128xf32> to vector<8x128xf32>
    %107 = arith.truncf %105 : vector<8x32xf32> to vector<8x32xbf16>
    %cst_14 = arith.constant dense<0.000000e+00> : vector<8x128xf32>
    %108 = tpu.matmul %107, %11, %cst_14 {dimension_numbers = #tpu.dot_dimension_numbers<[1], [0], [0], [1], [0, 0, 1, 1], [], []>} : vector<8x32xbf16>, vector<32x128xbf16>, vector<8x128xf32> -> vector<8x128xf32>
    %109 = arith.addf %106, %108 : vector<8x128xf32>
    %110 = arith.negf %109 : vector<8x128xf32>
    %111 = math.exp %110 : vector<8x128xf32>
    %cst_15 = arith.constant 1.000000e+00 : f32
    %112 = vector.broadcast %cst_15 : f32 to vector<8x128xf32>
    %113 = arith.addf %112, %111 : vector<8x128xf32>
    %114 = arith.divf %112, %113 : vector<8x128xf32>
    %115 = math.tanh %109 : vector<8x128xf32>
    %116 = vector.extract_strided_slice %114 {offsets = [0, 32], sizes = [8, 32], strides = [1, 1]} : vector<8x128xf32> to vector<8x32xf32>
    %117 = arith.mulf %116, %102 : vector<8x32xf32>
    %118 = vector.extract_strided_slice %114 {offsets = [0, 0], sizes = [8, 32], strides = [1, 1]} : vector<8x128xf32> to vector<8x32xf32>
    %119 = vector.extract_strided_slice %115 {offsets = [0, 64], sizes = [8, 32], strides = [1, 1]} : vector<8x128xf32> to vector<8x32xf32>
    %120 = arith.mulf %118, %119 : vector<8x32xf32>
    %121 = arith.addf %117, %120 : vector<8x32xf32>
    %122 = vector.extract_strided_slice %114 {offsets = [0, 96], sizes = [8, 32], strides = [1, 1]} : vector<8x128xf32> to vector<8x32xf32>
    %123 = math.tanh %121 : vector<8x32xf32>
    %124 = arith.mulf %122, %123 : vector<8x32xf32>
    %125 = vector.extract_strided_slice %24 {offsets = [40, 0], sizes = [8, 128], strides = [1, 1]} : vector<64x128xf32> to vector<8x128xf32>
    %126 = arith.truncf %124 : vector<8x32xf32> to vector<8x32xbf16>
    %cst_16 = arith.constant dense<0.000000e+00> : vector<8x128xf32>
    %127 = tpu.matmul %126, %11, %cst_16 {dimension_numbers = #tpu.dot_dimension_numbers<[1], [0], [0], [1], [0, 0, 1, 1], [], []>} : vector<8x32xbf16>, vector<32x128xbf16>, vector<8x128xf32> -> vector<8x128xf32>
    %128 = arith.addf %125, %127 : vector<8x128xf32>
    %129 = arith.negf %128 : vector<8x128xf32>
    %130 = math.exp %129 : vector<8x128xf32>
    %cst_17 = arith.constant 1.000000e+00 : f32
    %131 = vector.broadcast %cst_17 : f32 to vector<8x128xf32>
    %132 = arith.addf %131, %130 : vector<8x128xf32>
    %133 = arith.divf %131, %132 : vector<8x128xf32>
    %134 = math.tanh %128 : vector<8x128xf32>
    %135 = vector.extract_strided_slice %133 {offsets = [0, 32], sizes = [8, 32], strides = [1, 1]} : vector<8x128xf32> to vector<8x32xf32>
    %136 = arith.mulf %135, %121 : vector<8x32xf32>
    %137 = vector.extract_strided_slice %133 {offsets = [0, 0], sizes = [8, 32], strides = [1, 1]} : vector<8x128xf32> to vector<8x32xf32>
    %138 = vector.extract_strided_slice %134 {offsets = [0, 64], sizes = [8, 32], strides = [1, 1]} : vector<8x128xf32> to vector<8x32xf32>
    %139 = arith.mulf %137, %138 : vector<8x32xf32>
    %140 = arith.addf %136, %139 : vector<8x32xf32>
    %141 = vector.extract_strided_slice %133 {offsets = [0, 96], sizes = [8, 32], strides = [1, 1]} : vector<8x128xf32> to vector<8x32xf32>
    %142 = math.tanh %140 : vector<8x32xf32>
    %143 = arith.mulf %141, %142 : vector<8x32xf32>
    %144 = vector.extract_strided_slice %24 {offsets = [48, 0], sizes = [8, 128], strides = [1, 1]} : vector<64x128xf32> to vector<8x128xf32>
    %145 = arith.truncf %143 : vector<8x32xf32> to vector<8x32xbf16>
    %cst_18 = arith.constant dense<0.000000e+00> : vector<8x128xf32>
    %146 = tpu.matmul %145, %11, %cst_18 {dimension_numbers = #tpu.dot_dimension_numbers<[1], [0], [0], [1], [0, 0, 1, 1], [], []>} : vector<8x32xbf16>, vector<32x128xbf16>, vector<8x128xf32> -> vector<8x128xf32>
    %147 = arith.addf %144, %146 : vector<8x128xf32>
    %148 = arith.negf %147 : vector<8x128xf32>
    %149 = math.exp %148 : vector<8x128xf32>
    %cst_19 = arith.constant 1.000000e+00 : f32
    %150 = vector.broadcast %cst_19 : f32 to vector<8x128xf32>
    %151 = arith.addf %150, %149 : vector<8x128xf32>
    %152 = arith.divf %150, %151 : vector<8x128xf32>
    %153 = math.tanh %147 : vector<8x128xf32>
    %154 = vector.extract_strided_slice %152 {offsets = [0, 32], sizes = [8, 32], strides = [1, 1]} : vector<8x128xf32> to vector<8x32xf32>
    %155 = arith.mulf %154, %140 : vector<8x32xf32>
    %156 = vector.extract_strided_slice %152 {offsets = [0, 0], sizes = [8, 32], strides = [1, 1]} : vector<8x128xf32> to vector<8x32xf32>
    %157 = vector.extract_strided_slice %153 {offsets = [0, 64], sizes = [8, 32], strides = [1, 1]} : vector<8x128xf32> to vector<8x32xf32>
    %158 = arith.mulf %156, %157 : vector<8x32xf32>
    %159 = arith.addf %155, %158 : vector<8x32xf32>
    %160 = vector.extract_strided_slice %152 {offsets = [0, 96], sizes = [8, 32], strides = [1, 1]} : vector<8x128xf32> to vector<8x32xf32>
    %161 = math.tanh %159 : vector<8x32xf32>
    %162 = arith.mulf %160, %161 : vector<8x32xf32>
    %163 = vector.extract_strided_slice %24 {offsets = [56, 0], sizes = [8, 128], strides = [1, 1]} : vector<64x128xf32> to vector<8x128xf32>
    %164 = arith.truncf %162 : vector<8x32xf32> to vector<8x32xbf16>
    %cst_20 = arith.constant dense<0.000000e+00> : vector<8x128xf32>
    %165 = tpu.matmul %164, %11, %cst_20 {dimension_numbers = #tpu.dot_dimension_numbers<[1], [0], [0], [1], [0, 0, 1, 1], [], []>} : vector<8x32xbf16>, vector<32x128xbf16>, vector<8x128xf32> -> vector<8x128xf32>
    %166 = arith.addf %163, %165 : vector<8x128xf32>
    %167 = arith.negf %166 : vector<8x128xf32>
    %168 = math.exp %167 : vector<8x128xf32>
    %cst_21 = arith.constant 1.000000e+00 : f32
    %169 = vector.broadcast %cst_21 : f32 to vector<8x128xf32>
    %170 = arith.addf %169, %168 : vector<8x128xf32>
    %171 = arith.divf %169, %170 : vector<8x128xf32>
    %172 = math.tanh %166 : vector<8x128xf32>
    %173 = vector.extract_strided_slice %171 {offsets = [0, 32], sizes = [8, 32], strides = [1, 1]} : vector<8x128xf32> to vector<8x32xf32>
    %174 = arith.mulf %173, %159 : vector<8x32xf32>
    %175 = vector.extract_strided_slice %171 {offsets = [0, 0], sizes = [8, 32], strides = [1, 1]} : vector<8x128xf32> to vector<8x32xf32>
    %176 = vector.extract_strided_slice %172 {offsets = [0, 64], sizes = [8, 32], strides = [1, 1]} : vector<8x128xf32> to vector<8x32xf32>
    %177 = arith.mulf %175, %176 : vector<8x32xf32>
    %178 = arith.addf %174, %177 : vector<8x32xf32>
    %179 = vector.extract_strided_slice %171 {offsets = [0, 96], sizes = [8, 32], strides = [1, 1]} : vector<8x128xf32> to vector<8x32xf32>
    %180 = math.tanh %178 : vector<8x32xf32>
    %181 = arith.mulf %179, %180 : vector<8x32xf32>
    %182 = tpu.concatenate %48, %67, %86, %105, %124, %143, %162, %181 in 0 : vector<8x32xf32>, vector<8x32xf32>, vector<8x32xf32>, vector<8x32xf32>, vector<8x32xf32>, vector<8x32xf32>, vector<8x32xf32>, vector<8x32xf32> -> vector<64x32xf32>
    %183 = vector.broadcast %7 : vector<64x1xf32> to vector<64x32xf32>
    %184 = arith.mulf %182, %183 : vector<64x32xf32>
    %185 = arith.truncf %184 : vector<64x32xf32> to vector<64x32xbf16>
    %cst_22 = arith.constant dense<0.000000e+00> : vector<64x8xf32>
    %186 = tpu.matmul %185, %13, %cst_22 {dimension_numbers = #tpu.dot_dimension_numbers<[1], [0], [0], [1], [0, 0, 1, 1], [], []>} : vector<64x32xbf16>, vector<32x8xbf16>, vector<64x8xf32> -> vector<64x8xf32>
    %187 = vector.broadcast %19 : vector<1x8xf32> to vector<64x8xf32>
    %188 = arith.addf %186, %187 : vector<64x8xf32>
    %189 = arith.negf %184 : vector<64x32xf32>
    %190 = math.exp %189 : vector<64x32xf32>
    %cst_23 = arith.constant 1.000000e+00 : f32
    %191 = vector.broadcast %cst_23 : f32 to vector<64x32xf32>
    %192 = arith.addf %191, %190 : vector<64x32xf32>
    %193 = arith.divf %191, %192 : vector<64x32xf32>
    %194 = arith.truncf %193 : vector<64x32xf32> to vector<64x32xbf16>
    %195 = arith.negf %5 : vector<64x8xf32>
    %196 = math.exp %195 : vector<64x8xf32>
    %cst_24 = arith.constant 1.000000e+00 : f32
    %197 = vector.broadcast %cst_24 : f32 to vector<64x8xf32>
    %198 = arith.addf %197, %196 : vector<64x8xf32>
    %199 = arith.divf %197, %198 : vector<64x8xf32>
    %200 = arith.truncf %199 : vector<64x8xf32> to vector<64x8xbf16>
    %cst_25 = arith.constant dense<0.000000e+00> : vector<64x8xf32>
    %201 = tpu.matmul %194, %14, %cst_25 {dimension_numbers = #tpu.dot_dimension_numbers<[1], [0], [0], [1], [0, 0, 1, 1], [], []>} : vector<64x32xbf16>, vector<32x8xbf16>, vector<64x8xf32> -> vector<64x8xf32>
    %cst_26 = arith.constant dense<0.000000e+00> : vector<64x8xf32>
    %202 = tpu.matmul %200, %15, %cst_26 {dimension_numbers = #tpu.dot_dimension_numbers<[1], [0], [0], [1], [0, 0, 1, 1], [], []>} : vector<64x8xbf16>, vector<8x8xbf16>, vector<64x8xf32> -> vector<64x8xf32>
    %203 = arith.addf %201, %202 : vector<64x8xf32>
    %204 = vector.broadcast %20 : vector<1x8xf32> to vector<64x8xf32>
    %205 = arith.addf %203, %204 : vector<64x8xf32>
    %206 = arith.negf %205 : vector<64x8xf32>
    %207 = math.exp %206 : vector<64x8xf32>
    %cst_27 = arith.constant 1.000000e+00 : f32
    %208 = vector.broadcast %cst_27 : f32 to vector<64x8xf32>
    %209 = arith.addf %208, %207 : vector<64x8xf32>
    %210 = arith.divf %208, %209 : vector<64x8xf32>
    %211 = arith.truncf %210 : vector<64x8xf32> to vector<64x8xbf16>
    %cst_28 = arith.constant dense<0.000000e+00> : vector<64x48xf32>
    %212 = tpu.matmul %211, %16, %cst_28 {dimension_numbers = #tpu.dot_dimension_numbers<[1], [0], [0], [1], [0, 0, 1, 1], [], []>} : vector<64x8xbf16>, vector<8x48xbf16>, vector<64x48xf32> -> vector<64x48xf32>
    %213 = vector.broadcast %21 : vector<1x48xf32> to vector<64x48xf32>
    %214 = arith.addf %212, %213 : vector<64x48xf32>
    %215 = vector.extract_strided_slice %214 {offsets = [0, 0], sizes = [64, 16], strides = [1, 1]} : vector<64x48xf32> to vector<64x16xf32>
    %216 = vector.extract_strided_slice %214 {offsets = [0, 16], sizes = [64, 16], strides = [1, 1]} : vector<64x48xf32> to vector<64x16xf32>
    %cst_29 = arith.constant -5.000000e+00 : f32
    %cst_30 = arith.constant 3.000000e+00 : f32
    %217 = vector.broadcast %cst_29 : f32 to vector<64x16xf32>
    %218 = arith.maximumf %217, %216 : vector<64x16xf32>
    %219 = vector.broadcast %cst_30 : f32 to vector<64x16xf32>
    %220 = arith.minimumf %219, %218 : vector<64x16xf32>
    %221 = vector.extract_strided_slice %214 {offsets = [0, 32], sizes = [64, 16], strides = [1, 1]} : vector<64x48xf32> to vector<64x16xf32>
    %cst_31 = arith.constant dense<0xFF800000> : vector<64xf32>
    %222 = vector.multi_reduction <maximumf>, %221, %cst_31 [1] : vector<64x16xf32> to vector<64xf32>
    %223 = vector.shape_cast %222 : vector<64xf32> to vector<64x1xf32>
    %224 = vector.broadcast %223 : vector<64x1xf32> to vector<64x16xf32>
    %225 = arith.subf %221, %224 : vector<64x16xf32>
    %226 = math.exp %225 : vector<64x16xf32>
    %cst_32 = arith.constant dense<0.000000e+00> : vector<64xf32>
    %227 = vector.multi_reduction <add>, %226, %cst_32 [1] : vector<64x16xf32> to vector<64xf32>
    %228 = vector.shape_cast %227 : vector<64xf32> to vector<64x1xf32>
    %229 = math.log %228 : vector<64x1xf32>
    %230 = arith.addf %223, %229 : vector<64x1xf32>
    %231 = vector.broadcast %230 : vector<64x1xf32> to vector<64x16xf32>
    %232 = arith.subf %221, %231 : vector<64x16xf32>
    %cst_33 = arith.constant 1.000000e-10 : f32
    %233 = vector.broadcast %cst_33 : f32 to vector<64x1xf32>
    %234 = arith.maximumf %6, %233 : vector<64x1xf32>
    %235 = math.log %234 : vector<64x1xf32>
    %cst_34 = arith.constant 3.000000e-01 : f32
    %236 = vector.broadcast %cst_34 : f32 to vector<64x1xf32>
    %237 = arith.subf %235, %236 : vector<64x1xf32>
    %cst_35 = arith.constant 0.588235319 : f32
    %238 = vector.broadcast %cst_35 : f32 to vector<64x1xf32>
    %239 = arith.mulf %237, %238 : vector<64x1xf32>
    %cst_36 = arith.constant 0.000000e+00 : f32
    %240 = vector.broadcast %cst_36 : f32 to vector<64x16xf32>
    %241 = arith.subf %240, %220 : vector<64x16xf32>
    %242 = math.exp %241 : vector<64x16xf32>
    %243 = vector.broadcast %239 : vector<64x1xf32> to vector<64x16xf32>
    %244 = arith.subf %243, %215 : vector<64x16xf32>
    %245 = arith.mulf %244, %242 : vector<64x16xf32>
    %246 = arith.mulf %245, %245 : vector<64x16xf32>
    %cst_37 = arith.constant -5.000000e-01 : f32
    %247 = vector.broadcast %cst_37 : f32 to vector<64x16xf32>
    %248 = arith.mulf %247, %246 : vector<64x16xf32>
    %249 = arith.subf %248, %220 : vector<64x16xf32>
    %cst_38 = arith.constant 0.918938517 : f32
    %250 = vector.broadcast %cst_38 : f32 to vector<64x16xf32>
    %251 = arith.subf %249, %250 : vector<64x16xf32>
    %252 = arith.addf %232, %251 : vector<64x16xf32>
    %cst_39 = arith.constant dense<0xFF800000> : vector<64xf32>
    %253 = vector.multi_reduction <maximumf>, %252, %cst_39 [1] : vector<64x16xf32> to vector<64xf32>
    %254 = vector.shape_cast %253 : vector<64xf32> to vector<64x1xf32>
    %255 = vector.broadcast %254 : vector<64x1xf32> to vector<64x16xf32>
    %256 = arith.subf %252, %255 : vector<64x16xf32>
    %257 = math.exp %256 : vector<64x16xf32>
    %cst_40 = arith.constant dense<0.000000e+00> : vector<64xf32>
    %258 = vector.multi_reduction <add>, %257, %cst_40 [1] : vector<64x16xf32> to vector<64xf32>
    %259 = vector.shape_cast %258 : vector<64xf32> to vector<64x1xf32>
    %260 = math.log %259 : vector<64x1xf32>
    %261 = arith.addf %254, %260 : vector<64x1xf32>
    %262 = arith.subf %261, %235 : vector<64x1xf32>
    %cst_41 = arith.constant 0.530628264 : f32
    %263 = vector.broadcast %cst_41 : f32 to vector<64x1xf32>
    %264 = arith.subf %262, %263 : vector<64x1xf32>
    %c0_42 = arith.constant 0 : index
    %c0_43 = arith.constant 0 : index
    %265 = vector.load %arg3[%c0_42, %c0_43] : memref<64x16xf32, #tpu.memory_space<vmem>>, vector<64x8xf32>
    tpu.vector_store %arg3[%c0_42, %c0_43], %188 {strides = array<i32>} : memref<64x16xf32, #tpu.memory_space<vmem>>, vector<64x8xf32>,
    %c0_44 = arith.constant 0 : index
    %c8 = arith.constant 8 : index
    %266 = vector.load %arg3[%c0_44, %c8] : memref<64x16xf32, #tpu.memory_space<vmem>>, vector<64x1xf32>
    tpu.vector_store %arg3[%c0_44, %c8], %264 {strides = array<i32>} : memref<64x16xf32, #tpu.memory_space<vmem>>, vector<64x1xf32>,
    return
  }
}

</mosaic_0001>

<bundles_post_ra>
// kernel: cond_event_lstm_forward.1
= control target key start
LH: loop header
LB: loop body
LE: loop exit
PB: predicated region body
PF: predicated region fallthrough
CT: control target
= control target key end

     0   :  { %vm103_vm0 = vcmask 1043456   ;;  %s2360_s16 = smov 96   ;;  %vm99_vm1 = vcmask 64512   ;;  %vm53_vm2 = vcmask 130048   ;;  %vm133_vm3 = vcmask 261120   ;;  %s2361_s27 = smov 64   ;;  %s3205_s0 = inlined_call_operand.vmem [shape: f32[64,128], index: 0, kind: input, shape index: {}]   ;;  %s3206_s1 = inlined_call_operand.vmem [shape: bf16[160,128], index: 1, kind: input, shape index: {}]   ;;  %s3207_s2 = inlined_call_operand.vmem [shape: f32[8,128], index: 2, kind: input, shape index: {}]   ;;  %s3208_s3 = inlined_call_operand.vmem [shape: f32[64,16], index: 3, kind: output, shape index: {}]  }
   0x1   :  { %v2389_v0 = vld [vmem:[%s3205_s0] sm:$0xff]  ;;  %v29_v1 = vld [vmem:[%s3206_s1 + $0x18] sm:$0xf]  ;;  %v2404_v5 = vld [vmem:[%s3206_s1 + $0x10] sm:$0xff]  ;;  %s2362_s28 = smov 32   ;;  %s2364_s14 = smov 112  }
   0x2   :  { %v45_v2 = vpack.c.bf16 %v2389_v0, %v2389_v0  ;;  %v105_v3 = vsel %vm103_vm0, %v29_v1, 0  ;;  %v2074_v4 = vld [vmem:[%s3206_s1] sm:$0xff]  ;;  %143 = vmatpush.bf16.msra.mxu2 %v2404_v5  ;;  %201 = vmatpush.bf16.msra.mxu3 %v2404_v5  ;;  %v2413_v7 = vld [vmem:[%s3205_s0 + $0x8] sm:$0xff] }
   0x3   :  { %114 = vmatpush.bf16.msra.mxu1 %v105_v3  ;;  %73 = vmatpush.bf16.msra.mxu0 %v2074_v4  ;;  %v41_v8 = vpack.c.bf16 %v2413_v7, %v2389_v0  ;;  %v2420_v9 = vld [vmem:[%s3206_s1 + $0x8] sm:$0xff]  ;;  %v40_v10 = vld [vmem:[%s3207_s2] sm:$0xff] }
   0x4   :  { %97 = vrot.lane.b32.xlu0 %v45_v2, %s2360_s16  ;;  %v95_v11 = vperm.slane %v40_v10, 1  ;;  %v2438_v16 = vperm.slane %v40_v10, 0  ;;  %v2464_v10 = vld [vmem:[%s3205_s0 + $0x18] sm:$0xff] }
   0x6   :  { %1965 = vmatmul.msk.bf16.vlgmr.msra.gmra.mxu0 %vm53_vm2, %v41_v8  ;;  %144 = vmatpush.bf16.msra.mxu2 %v2420_v9 }
   0x7   :  { %259 = vmatpush.bf16.msrb.mxu1 %v2404_v5  ;;  %202 = vmatpush.bf16.msra.mxu3 %v2420_v9 }
   0xa   :  { %317 = vmatpush.bf16.msrb.mxu2 %v2404_v5 }
   0xb   :  { %260 = vmatpush.bf16.msrb.mxu1 %v2420_v9  ;;  %375 = vmatpush.bf16.msrb.mxu3 %v2404_v5 }
   0xe   :  { %318 = vmatpush.bf16.msrb.mxu2 %v2420_v9 }
   0xf   :  { %376 = vmatpush.bf16.msrb.mxu3 %v2420_v9 }
  0x76   :  { %v98_v6 = vpop.permute.xlu0 %97 }
  0x77   :  { %1969 = vmatmul.msk.bf16.vlgmr.msra.gmra.mxu1 %vm99_vm1, %v98_v6 }
  0x78   :  { %433 = vmatpush.bf16.msra.mxu1 %v2404_v5 }
  0x7c   :  { %434 = vmatpush.bf16.msra.mxu1 %v2420_v9 }
  0x83   :  { %v75_v17 = vpop.f32.mrf.mxu0 }
  0x84   :  { %v76_v18 = vadd.f32 %v75_v17, %v2438_v16 }
  0x8b   :  { %v77_v46 = vpop.f32.mrf.mxu0 }
  0x8c   :  { %v78_v47 = vadd.f32 %v77_v46, %v2438_v16 }
  0xf4   :  { %v116_v12 = vpop.f32.mrf.mxu1 }
  0xf5   :  { %v117_v13 = vadd.f32 %v116_v12, %v95_v11 }
  0xf7   :  { %v120_v14 = vpack.c.bf16 %v117_v13, %v117_v13 }
  0xf9   :  { %1978 = vmatmul.msk.bf16.vlgmr.msra.gmra.mxu2 %vm133_vm3, %v120_v14 }
  0xfa   :  { %491 = vmatpush.bf16.msra.mxu2 %v2404_v5 }
  0xfc   :  { %v118_v15 = vpop.f32.mrf.mxu1 }
  0xfe   :  { %492 = vmatpush.bf16.msra.mxu2 %v2420_v9 }
 0x17c   :  { %v146_v19 = vpop.f32.mrf.mxu2 }
 0x17d   :  { %v150_v20 = vadd.f32 %v146_v19, %v76_v18 }
 0x17f   :  { %2093 = vtanh.f32 %v150_v20  ;;  %v1979_v23 = vmul.f32 -1.442695, %v150_v20 }
 0x181   :  { %2095 = vpow2.f32 %v1979_v23 }
 0x184   :  { %v148_v21 = vpop.f32.mrf.mxu2 }
 0x185   :  { %v2094_v22 = vpop.eup %2093 }
 0x186   :  { %173 = vrot.lane.b32.xlu0 %v2094_v22, %s2361_s27 }
 0x187   :  { %v2096_v24 = vpop.eup %2095 }
 0x188   :  { %v154_v25 = vadd.f32 1.0, %v2096_v24 }
 0x18a   :  { %2097 = vrcp.f32 %v154_v25  ;;  %v166_v31 = vand.u32 2147483648, %v154_v25  ;;  %vm160_vm5 = vweird.f32 %v154_v25  ;;  %v164_v32 = vand.u32 2147483647, %v154_v25 }
 0x18c   :  { %v167_v34 = vor.u32 1.1754944e-38, %v166_v31  ;;  %vm165_vm7 = vcmp.eq.f32.partialorder %v164_v32, 8.507059e+37 }
 0x190   :  { %v2098_v26 = vpop.eup %2097 }
 0x191   :  { %v156_v27 = vmul.f32 %v2098_v26, %v154_v25  ;;  %vm161_vm4 = vweird.f32 %v2098_v26 }
 0x192   :  { %vm162_vm6 = vmor %vm160_vm5, %vm161_vm4 }
 0x193   :  { %v157_v28 = vsub.f32 1.0, %v156_v27 }
 0x195   :  { %v158_v29 = vmul.f32 %v2098_v26, %v157_v28 }
 0x197   :  { %v159_v30 = vadd.f32 %v2098_v26, %v158_v29 }
 0x199   :  { %v163_v33 = vsel %vm162_vm6, %v2098_v26, %v159_v30 }
 0x19a   :  { %v168_v36 = vsel %vm165_vm7, %v167_v34, %v163_v33 }
 0x19b   :  { %v171_v38 = vmul.f32 %v168_v36, %v117_v13 }
 0x1f8   :  { %v174_v35 = vpop.permute.xlu0 %173 }
 0x1f9   :  { %v176_v37 = vmul.f32 %v174_v35, %v168_v36 }
 0x1fb   :  { %178 = vrot.lane.b32.xlu1 %v176_v37, %s2362_s28 }
 0x26d   :  { %v179_v39 = vpop.permute.xlu1 %178 }
 0x26e   :  { %v181_v40 = vadd.f32 %v179_v39, %v171_v38 }
 0x270   :  { %2099 = vtanh.f32 %v181_v40 }
 0x276   :  { %v2100_v41 = vpop.eup %2099 }
 0x277   :  { %184 = vrot.lane.b32.xlu1 %v2100_v41, %s2361_s27 }
 0x2e9   :  { %v185_v42 = vpop.permute.xlu1 %184 }
 0x2ea   :  { %v2444_v43 = vmul.f32 %v185_v42, %v168_v36 }
 0x2ec   :  { %v188_v44 = vpack.c.bf16 %v2444_v43, %v2444_v43 }
 0x2ee   :  { %190 = vrot.lane.b32.xlu2 %v188_v44, %s2362_s28 }
 0x348   :  { %v191_v45 = vpop.permute.xlu2 %190 }
 0x349   :  { %1980 = vmatmul.msk.bf16.vlgmr.msra.gmra.mxu3 %vm133_vm3, %v191_v45 }
 0x34a   :  { %549 = vmatpush.bf16.msra.mxu3 %v2404_v5 }
 0x34e   :  { %550 = vmatpush.bf16.msra.mxu3 %v2420_v9  ;;  %v2459_v9 = vld [vmem:[%s3205_s0 + $0x10] sm:$0xff] }
 0x34f   :  { %v42_v11 = vpack.c.bf16 %v2464_v10, %v2459_v9 }
 0x351   :  { %1966 = vmatmul.msk.bf16.gmra.mxu0 %vm53_vm2, %v42_v11 }
 0x3cc   :  { %v204_v48 = vpop.f32.mrf.mxu3 }
 0x3cd   :  { %v208_v49 = vadd.f32 %v204_v48, %v78_v47 }
 0x3ce   :  { %v80_v17 = vpop.f32.mrf.mxu0 }
 0x3cf   :  { %2101 = vtanh.f32 %v208_v49  ;;  %v1981_v52 = vmul.f32 -1.442695, %v208_v49  ;;  %v81_v18 = vadd.f32 %v80_v17, %v2438_v16 }
 0x3d1   :  { %2103 = vpow2.f32 %v1981_v52 }
 0x3d4   :  { %v206_v50 = vpop.f32.mrf.mxu3 }
 0x3d5   :  { %v2102_v51 = vpop.eup %2101 }
 0x3d6   :  { %231 = vrot.lane.b32.xlu2 %v2102_v51, %s2361_s27  ;;  %v82_v47 = vpop.f32.mrf.mxu0 }
 0x3d7   :  { %v2104_v53 = vpop.eup %2103  ;;  %v83_v48 = vadd.f32 %v82_v47, %v2438_v16 }
 0x3d8   :  { %v212_v54 = vadd.f32 1.0, %v2104_v53 }
 0x3da   :  { %2105 = vrcp.f32 %v212_v54  ;;  %v224_v60 = vand.u32 2147483648, %v212_v54  ;;  %vm218_vm9 = vweird.f32 %v212_v54  ;;  %v222_v61 = vand.u32 2147483647, %v212_v54 }
 0x3dc   :  { %v225_v63 = vor.u32 1.1754944e-38, %v224_v60  ;;  %vm223_vm11 = vcmp.eq.f32.partialorder %v222_v61, 8.507059e+37 }
 0x3e0   :  { %v2106_v55 = vpop.eup %2105 }
 0x3e1   :  { %v214_v56 = vmul.f32 %v2106_v55, %v212_v54  ;;  %vm219_vm8 = vweird.f32 %v2106_v55 }
 0x3e2   :  { %vm220_vm10 = vmor %vm218_vm9, %vm219_vm8 }
 0x3e3   :  { %v215_v57 = vsub.f32 1.0, %v214_v56 }
 0x3e5   :  { %v216_v58 = vmul.f32 %v2106_v55, %v215_v57 }
 0x3e7   :  { %v217_v59 = vadd.f32 %v2106_v55, %v216_v58 }
 0x3e9   :  { %v221_v62 = vsel %vm220_vm10, %v2106_v55, %v217_v59 }
 0x3ea   :  { %v226_v2 = vsel %vm223_vm11, %v225_v63, %v221_v62 }
 0x3eb   :  { %v229_v4 = vmul.f32 %v226_v2, %v181_v40 }
 0x430   :  { %v232_v1 = vpop.permute.xlu2 %231 }
 0x431   :  { %v234_v3 = vmul.f32 %v232_v1, %v226_v2 }
 0x433   :  { %236 = vrot.lane.b32.xlu0 %v234_v3, %s2362_s28 }
 0x4a5   :  { %v237_v5 = vpop.permute.xlu0 %236 }
 0x4a6   :  { %v239_v6 = vadd.f32 %v237_v5, %v229_v4 }
 0x4a8   :  { %2107 = vtanh.f32 %v239_v6 }
 0x4ae   :  { %v2108_v8 = vpop.eup %2107 }
 0x4af   :  { %242 = vrot.lane.b32.xlu1 %v2108_v8, %s2361_s27 }
 0x521   :  { %v243_v12 = vpop.permute.xlu1 %242 }
 0x522   :  { %v2469_v13 = vmul.f32 %v243_v12, %v226_v2  ;;  %v2492_v12 = vld [vmem:[%s3205_s0 + $0x20] sm:$0xff] }
 0x524   :  { %v246_v14 = vpack.c.bf16 %v2469_v13, %v2469_v13 }
 0x526   :  { %248 = vrot.lane.b32.xlu2 %v246_v14, %s2362_s28  ;;  %v2497_v14 = vld [vmem:[%s3205_s0 + $0x28] sm:$0xff] }
 0x580   :  { %v249_v15 = vpop.permute.xlu2 %248 }
 0x581   :  { %1982 = vmatmul.msk.bf16.vlgmr.msrb.gmra.mxu1 %vm133_vm3, %v249_v15  ;;  %v43_v15 = vpack.c.bf16 %v2497_v14, %v2492_v12 }
 0x583   :  { %1967 = vmatmul.msk.bf16.gmra.mxu0 %vm53_vm2, %v43_v15 }
 0x5fe   :  { %v262_v19 = vpop.f32.mrf.mxu1 }
 0x5ff   :  { %v266_v20 = vadd.f32 %v262_v19, %v81_v18 }
 0x601   :  { %2109 = vtanh.f32 %v266_v20  ;;  %v1983_v23 = vmul.f32 -1.442695, %v266_v20 }
 0x603   :  { %2111 = vpow2.f32 %v1983_v23 }
 0x606   :  { %v264_v21 = vpop.f32.mrf.mxu1 }
 0x607   :  { %v2110_v22 = vpop.eup %2109  ;;  %v85_v21 = vpop.f32.mrf.mxu0 }
 0x608   :  { %289 = vrot.lane.b32.xlu0 %v2110_v22, %s2361_s27  ;;  %v86_v22 = vadd.f32 %v85_v21, %v2438_v16 }
 0x609   :  { %v2112_v24 = vpop.eup %2111 }
 0x60a   :  { %v270_v25 = vadd.f32 1.0, %v2112_v24 }
 0x60c   :  { %2113 = vrcp.f32 %v270_v25  ;;  %v282_v31 = vand.u32 2147483648, %v270_v25  ;;  %vm276_vm13 = vweird.f32 %v270_v25  ;;  %v280_v32 = vand.u32 2147483647, %v270_v25 }
 0x60e   :  { %v283_v34 = vor.u32 1.1754944e-38, %v282_v31  ;;  %vm281_vm15 = vcmp.eq.f32.partialorder %v280_v32, 8.507059e+37 }
 0x612   :  { %v2114_v26 = vpop.eup %2113 }
 0x613   :  { %v272_v27 = vmul.f32 %v2114_v26, %v270_v25  ;;  %vm277_vm12 = vweird.f32 %v2114_v26 }
 0x614   :  { %vm278_vm14 = vmor %vm276_vm13, %vm277_vm12 }
 0x615   :  { %v273_v28 = vsub.f32 1.0, %v272_v27 }
 0x617   :  { %v274_v29 = vmul.f32 %v2114_v26, %v273_v28 }
 0x619   :  { %v275_v30 = vadd.f32 %v2114_v26, %v274_v29 }
 0x61b   :  { %v279_v33 = vsel %vm278_vm14, %v2114_v26, %v275_v30 }
 0x61c   :  { %v284_v36 = vsel %vm281_vm15, %v283_v34, %v279_v33 }
 0x61d   :  { %v287_v38 = vmul.f32 %v284_v36, %v239_v6 }
 0x67a   :  { %v290_v35 = vpop.permute.xlu0 %289 }
 0x67b   :  { %v292_v37 = vmul.f32 %v290_v35, %v284_v36 }
 0x67d   :  { %294 = vrot.lane.b32.xlu1 %v292_v37, %s2362_s28 }
 0x6ef   :  { %v295_v39 = vpop.permute.xlu1 %294 }
 0x6f0   :  { %v297_v40 = vadd.f32 %v295_v39, %v287_v38 }
 0x6f2   :  { %2115 = vtanh.f32 %v297_v40 }
 0x6f8   :  { %v2116_v41 = vpop.eup %2115 }
 0x6f9   :  { %300 = vrot.lane.b32.xlu2 %v2116_v41, %s2361_s27 }
 0x753   :  { %v301_v42 = vpop.permute.xlu2 %300 }
 0x754   :  { %v2479_v44 = vmul.f32 %v301_v42, %v284_v36 }
 0x756   :  { %v304_v45 = vpack.c.bf16 %v2479_v44, %v2479_v44 }
 0x758   :  { %306 = vrot.lane.b32.xlu0 %v304_v45, %s2362_s28 }
 0x7ca   :  { %v307_v46 = vpop.permute.xlu0 %306 }
 0x7cb   :  { %1984 = vmatmul.msk.bf16.vlgmr.msrb.gmra.mxu2 %vm133_vm3, %v307_v46 }
 0x84e   :  { %v320_v49 = vpop.f32.mrf.mxu2 }
 0x84f   :  { %v324_v50 = vadd.f32 %v320_v49, %v83_v48 }
 0x851   :  { %2117 = vtanh.f32 %v324_v50  ;;  %v1985_v53 = vmul.f32 -1.442695, %v324_v50 }
 0x853   :  { %2119 = vpow2.f32 %v1985_v53 }
 0x856   :  { %v322_v51 = vpop.f32.mrf.mxu2 }
 0x857   :  { %v2118_v52 = vpop.eup %2117 }
 0x858   :  { %347 = vrot.lane.b32.xlu1 %v2118_v52, %s2361_s27  ;;  %v87_v52 = vpop.f32.mrf.mxu0 }
 0x859   :  { %v2120_v54 = vpop.eup %2119  ;;  %v88_v53 = vadd.f32 %v87_v52, %v2438_v16 }
 0x85a   :  { %v328_v55 = vadd.f32 1.0, %v2120_v54 }
 0x85c   :  { %2121 = vrcp.f32 %v328_v55  ;;  %v340_v61 = vand.u32 2147483648, %v328_v55  ;;  %vm334_vm5 = vweird.f32 %v328_v55  ;;  %v338_v62 = vand.u32 2147483647, %v328_v55 }
 0x85e   :  { %v341_v1 = vor.u32 1.1754944e-38, %v340_v61  ;;  %vm339_vm7 = vcmp.eq.f32.partialorder %v338_v62, 8.507059e+37 }
 0x862   :  { %v2122_v56 = vpop.eup %2121 }
 0x863   :  { %v330_v57 = vmul.f32 %v2122_v56, %v328_v55  ;;  %vm335_vm4 = vweird.f32 %v2122_v56 }
 0x864   :  { %vm336_vm6 = vmor %vm334_vm5, %vm335_vm4 }
 0x865   :  { %v331_v58 = vsub.f32 1.0, %v330_v57 }
 0x867   :  { %v332_v59 = vmul.f32 %v2122_v56, %v331_v58 }
 0x869   :  { %v333_v60 = vadd.f32 %v2122_v56, %v332_v59 }
 0x86b   :  { %v337_v63 = vsel %vm336_vm6, %v2122_v56, %v333_v60 }
 0x86c   :  { %v342_v3 = vsel %vm339_vm7, %v341_v1, %v337_v63 }
 0x86d   :  { %v345_v5 = vmul.f32 %v342_v3, %v297_v40 }
 0x8ca   :  { %v348_v2 = vpop.permute.xlu1 %347 }
 0x8cb   :  { %v350_v4 = vmul.f32 %v348_v2, %v342_v3 }
 0x8cd   :  { %352 = vrot.lane.b32.xlu2 %v350_v4, %s2362_s28 }
 0x927   :  { %v353_v6 = vpop.permute.xlu2 %352 }
 0x928   :  { %v355_v8 = vadd.f32 %v353_v6, %v345_v5 }
 0x92a   :  { %2123 = vtanh.f32 %v355_v8 }
 0x930   :  { %v2124_v11 = vpop.eup %2123 }
 0x931   :  { %358 = vrot.lane.b32.xlu0 %v2124_v11, %s2361_s27 }
 0x9a3   :  { %v359_v17 = vpop.permute.xlu0 %358 }
 0x9a4   :  { %v2502_v18 = vmul.f32 %v359_v17, %v342_v3 }
 0x9a6   :  { %v362_v19 = vpack.c.bf16 %v2502_v18, %v2502_v18 }
 0x9a8   :  { %364 = vrot.lane.b32.xlu1 %v362_v19, %s2362_s28 }
 0xa1a   :  { %v365_v20 = vpop.permute.xlu1 %364 }
 0xa1b   :  { %1986 = vmatmul.msk.bf16.vlgmr.msrb.gmra.mxu3 %vm133_vm3, %v365_v20 }
 0xa9e   :  { %v378_v23 = vpop.f32.mrf.mxu3 }
 0xa9f   :  { %v382_v24 = vadd.f32 %v378_v23, %v86_v22  ;;  %v2525_v22 = vld [vmem:[%s3205_s0 + $0x30] sm:$0xff]  ;;  %v2530_v23 = vld [vmem:[%s3205_s0 + $0x38] sm:$0xff] }
 0xaa1   :  { %2125 = vtanh.f32 %v382_v24  ;;  %v1987_v27 = vmul.f32 -1.442695, %v382_v24  ;;  %v44_v24 = vpack.c.bf16 %v2530_v23, %v2525_v22 }
 0xaa3   :  { %2127 = vpow2.f32 %v1987_v27  ;;  %1968 = vmatmul.msk.bf16.gmra.mxu0 %vm53_vm2, %v44_v24 }
 0xaa6   :  { %v380_v25 = vpop.f32.mrf.mxu3 }
 0xaa7   :  { %v2126_v26 = vpop.eup %2125 }
 0xaa8   :  { %405 = vrot.lane.b32.xlu2 %v2126_v26, %s2361_s27 }
 0xaa9   :  { %v2128_v28 = vpop.eup %2127 }
 0xaaa   :  { %v386_v29 = vadd.f32 1.0, %v2128_v28 }
 0xaac   :  { %2129 = vrcp.f32 %v386_v29  ;;  %v398_v35 = vand.u32 2147483648, %v386_v29  ;;  %vm392_vm9 = vweird.f32 %v386_v29  ;;  %v396_v36 = vand.u32 2147483647, %v386_v29 }
 0xaae   :  { %v399_v38 = vor.u32 1.1754944e-38, %v398_v35  ;;  %vm397_vm11 = vcmp.eq.f32.partialorder %v396_v36, 8.507059e+37 }
 0xab2   :  { %v2130_v30 = vpop.eup %2129 }
 0xab3   :  { %v388_v31 = vmul.f32 %v2130_v30, %v386_v29  ;;  %vm393_vm8 = vweird.f32 %v2130_v30 }
 0xab4   :  { %vm394_vm10 = vmor %vm392_vm9, %vm393_vm8 }
 0xab5   :  { %v389_v32 = vsub.f32 1.0, %v388_v31 }
 0xab7   :  { %v390_v33 = vmul.f32 %v2130_v30, %v389_v32 }
 0xab9   :  { %v391_v34 = vadd.f32 %v2130_v30, %v390_v33 }
 0xabb   :  { %v395_v37 = vsel %vm394_vm10, %v2130_v30, %v391_v34 }
 0xabc   :  { %v400_v40 = vsel %vm397_vm11, %v399_v38, %v395_v37 }
 0xabd   :  { %v403_v42 = vmul.f32 %v400_v40, %v355_v8 }
 0xb02   :  { %v406_v39 = vpop.permute.xlu2 %405 }
 0xb03   :  { %v408_v41 = vmul.f32 %v406_v39, %v400_v40 }
 0xb05   :  { %410 = vrot.lane.b32.xlu0 %v408_v41, %s2362_s28 }
 0xb20   :  { %v90_v29 = vpop.f32.mrf.mxu0 }
 0xb21   :  { %v91_v30 = vadd.f32 %v90_v29, %v2438_v16 }
 0xb77   :  { %v411_v45 = vpop.permute.xlu0 %410 }
 0xb78   :  { %v413_v46 = vadd.f32 %v411_v45, %v403_v42 }
 0xb7a   :  { %2131 = vtanh.f32 %v413_v46 }
 0xb80   :  { %v2132_v47 = vpop.eup %2131 }
 0xb81   :  { %416 = vrot.lane.b32.xlu1 %v2132_v47, %s2361_s27 }
 0xbf3   :  { %v417_v48 = vpop.permute.xlu1 %416 }
 0xbf4   :  { %v2512_v49 = vmul.f32 %v417_v48, %v400_v40 }
 0xbf6   :  { %v420_v50 = vpack.c.bf16 %v2512_v49, %v2512_v49 }
 0xbf8   :  { %422 = vrot.lane.b32.xlu2 %v420_v50, %s2362_s28 }
 0xc52   :  { %v423_v51 = vpop.permute.xlu2 %422 }
 0xc53   :  { %1988 = vmatmul.msk.bf16.vlgmr.msra.gmra.mxu1 %vm133_vm3, %v423_v51 }
 0xcd0   :  { %v436_v54 = vpop.f32.mrf.mxu1 }
 0xcd1   :  { %v440_v55 = vadd.f32 %v436_v54, %v88_v53 }
 0xcd3   :  { %2133 = vtanh.f32 %v440_v55  ;;  %v1989_v58 = vmul.f32 -1.442695, %v440_v55 }
 0xcd5   :  { %2135 = vpow2.f32 %v1989_v58 }
 0xcd8   :  { %v438_v56 = vpop.f32.mrf.mxu1 }
 0xcd9   :  { %v2134_v57 = vpop.eup %2133 }
 0xcda   :  { %463 = vrot.lane.b32.xlu0 %v2134_v57, %s2361_s27  ;;  %v2363_v57 = vmov 25  }
 0xcdb   :  { %v2136_v59 = vpop.eup %2135  ;;  %2087 = vset.pattern.permute.xlu1 %v2363_v57  ;;  %2088 = vset.pattern.permute.xlu2 %v2363_v57 }
 0xcdc   :  { %v444_v60 = vadd.f32 1.0, %v2136_v59  ;;  %2089 = vset.pattern.permute.xlu0 %v2363_v57 }
 0xcde   :  { %2137 = vrcp.f32 %v444_v60  ;;  %v456_v3 = vand.u32 2147483648, %v444_v60  ;;  %vm450_vm13 = vweird.f32 %v444_v60  ;;  %v454_v4 = vand.u32 2147483647, %v444_v60 }
 0xce0   :  { %v457_v6 = vor.u32 1.1754944e-38, %v456_v3  ;;  %vm455_vm15 = vcmp.eq.f32.partialorder %v454_v4, 8.507059e+37 }
 0xce4   :  { %v2138_v61 = vpop.eup %2137 }
 0xce5   :  { %v446_v62 = vmul.f32 %v2138_v61, %v444_v60  ;;  %vm451_vm12 = vweird.f32 %v2138_v61 }
 0xce6   :  { %vm452_vm14 = vmor %vm450_vm13, %vm451_vm12 }
 0xce7   :  { %v447_v63 = vsub.f32 1.0, %v446_v62  ;;  %v92_v62 = vpop.f32.mrf.mxu0 }
 0xce9   :  { %v448_v1 = vmul.f32 %v2138_v61, %v447_v63  ;;  %v93_v63 = vadd.f32 %v92_v62, %v2438_v16 }
 0xceb   :  { %v449_v2 = vadd.f32 %v2138_v61, %v448_v1 }
 0xced   :  { %v453_v5 = vsel %vm452_vm14, %v2138_v61, %v449_v2 }
 0xcee   :  { %v458_v11 = vsel %vm455_vm15, %v457_v6, %v453_v5 }
 0xcef   :  { %v461_v17 = vmul.f32 %v458_v11, %v413_v46 }
 0xd4c   :  { %v464_v8 = vpop.permute.xlu0 %463 }
 0xd4d   :  { %v466_v15 = vmul.f32 %v464_v8, %v458_v11  ;;  %v2016_v8 = vmul.f32 -1.442695, %v2459_v9 }
 0xd4f   :  { %468 = vrot.lane.b32.xlu1 %v466_v15, %s2362_s28 }
 0xdc1   :  { %v469_v19 = vpop.permute.xlu1 %468 }
 0xdc2   :  { %v471_v20 = vadd.f32 %v469_v19, %v461_v17 }
 0xdc4   :  { %2139 = vtanh.f32 %v471_v20 }
 0xdca   :  { %v2140_v21 = vpop.eup %2139 }
 0xdcb   :  { %474 = vrot.lane.b32.xlu2 %v2140_v21, %s2361_s27 }
 0xe25   :  { %v475_v25 = vpop.permute.xlu2 %474 }
 0xe26   :  { %v2535_v26 = vmul.f32 %v475_v25, %v458_v11  ;;  %v2017_v11 = vmul.f32 -1.442695, %v2464_v10 }
 0xe28   :  { %v478_v27 = vpack.c.bf16 %v2535_v26, %v2535_v26 }
 0xe2a   :  { %480 = vrot.lane.b32.xlu0 %v478_v27, %s2362_s28 }
 0xe9c   :  { %v481_v28 = vpop.permute.xlu0 %480 }
 0xe9d   :  { %1990 = vmatmul.msk.bf16.vlgmr.msra.gmra.mxu2 %vm133_vm3, %v481_v28 }
 0xf20   :  { %v494_v31 = vpop.f32.mrf.mxu2 }
 0xf21   :  { %v498_v32 = vadd.f32 %v494_v31, %v91_v30 }
 0xf23   :  { %2141 = vtanh.f32 %v498_v32  ;;  %v1991_v35 = vmul.f32 -1.442695, %v498_v32 }
 0xf25   :  { %2143 = vpow2.f32 %v1991_v35 }
 0xf28   :  { %v496_v33 = vpop.f32.mrf.mxu2 }
 0xf29   :  { %v2142_v34 = vpop.eup %2141 }
 0xf2a   :  { %521 = vrot.lane.b32.xlu1 %v2142_v34, %s2361_s27 }
 0xf2b   :  { %v2144_v36 = vpop.eup %2143 }
 0xf2c   :  { %v502_v37 = vadd.f32 1.0, %v2144_v36 }
 0xf2e   :  { %2145 = vrcp.f32 %v502_v37  ;;  %v514_v45 = vand.u32 2147483648, %v502_v37  ;;  %vm508_vm5 = vweird.f32 %v502_v37  ;;  %v512_v46 = vand.u32 2147483647, %v502_v37 }
 0xf30   :  { %v515_v48 = vor.u32 1.1754944e-38, %v514_v45  ;;  %vm513_vm7 = vcmp.eq.f32.partialorder %v512_v46, 8.507059e+37 }
 0xf34   :  { %v2146_v38 = vpop.eup %2145 }
 0xf35   :  { %v504_v39 = vmul.f32 %v2146_v38, %v502_v37  ;;  %vm509_vm4 = vweird.f32 %v2146_v38 }
 0xf36   :  { %vm510_vm6 = vmor %vm508_vm5, %vm509_vm4 }
 0xf37   :  { %v505_v40 = vsub.f32 1.0, %v504_v39 }
 0xf39   :  { %v506_v41 = vmul.f32 %v2146_v38, %v505_v40 }
 0xf3b   :  { %v507_v42 = vadd.f32 %v2146_v38, %v506_v41 }
 0xf3d   :  { %v511_v47 = vsel %vm510_vm6, %v2146_v38, %v507_v42 }
 0xf3e   :  { %v516_v51 = vsel %vm513_vm7, %v515_v48, %v511_v47 }
 0xf3f   :  { %v519_v53 = vmul.f32 %v516_v51, %v471_v20 }
 0xf9c   :  { %v522_v50 = vpop.permute.xlu1 %521 }
 0xf9d   :  { %v524_v52 = vmul.f32 %v522_v50, %v516_v51 }
 0xf9f   :  { %526 = vrot.lane.b32.xlu2 %v524_v52, %s2362_s28 }
 0xff9   :  { %v527_v54 = vpop.permute.xlu2 %526 }
 0xffa   :  { %v2544_v55 = vadd.f32 %v527_v54, %v519_v53 }
 0xffc   :  { %2147 = vtanh.f32 %v2544_v55 }
0x1002   :  { %v2148_v56 = vpop.eup %2147 }
0x1003   :  { %532 = vrot.lane.b32.xlu0 %v2148_v56, %s2361_s27 }
0x1075   :  { %v533_v58 = vpop.permute.xlu0 %532 }
0x1076   :  { %v2548_v59 = vmul.f32 %v533_v58, %v516_v51 }
0x1078   :  { %v536_v60 = vpack.c.bf16 %v2548_v59, %v2548_v59 }
0x107a   :  { %538 = vrot.lane.b32.xlu1 %v536_v60, %s2362_s28 }
0x1082   :  { %596 = vperm.xlu1 %2087, %v2389_v0  }
0x108a   :  { %611 = vperm.xlu1 %2087, %v2464_v10  }
0x1092   :  { %621 = vperm.xlu1 %2087, %v2497_v14  }
0x109a   :  { %631 = vperm.xlu1 %2087, %v2530_v23  }
0x10ec   :  { %v539_v61 = vpop.permute.xlu1 %538 }
0x10ed   :  { %1992 = vmatmul.msk.bf16.vlgmr.msra.gmra.mxu3 %vm133_vm3, %v539_v61 }
0x10f4   :  { %v597_v16 = vpop.permute.xlu1 %596 }
0x10f5   :  { %v2567_v27 = vmul.f32 %v597_v16, %v2444_v43 }
0x10f7   :  { %v2006_v10 = vmul.f32 -1.442695, %v2567_v27 }
0x1170   :  { %v552_v1 = vpop.f32.mrf.mxu3 }
0x1171   :  { %v556_v2 = vadd.f32 %v552_v1, %v93_v63 }
0x1173   :  { %2149 = vtanh.f32 %v556_v2  ;;  %v1993_v0 = vmul.f32 -1.442695, %v556_v2 }
0x1175   :  { %2151 = vpow2.f32 %v1993_v0 }
0x1178   :  { %v554_v3 = vpop.f32.mrf.mxu3 }
0x1179   :  { %v2150_v4 = vpop.eup %2149 }
0x117a   :  { %579 = vrot.lane.b32.xlu2 %v2150_v4, %s2361_s27 }
0x117b   :  { %v2152_v5 = vpop.eup %2151 }
0x117c   :  { %v560_v6 = vadd.f32 1.0, %v2152_v5 }
0x117e   :  { %2153 = vrcp.f32 %v560_v6  ;;  %v570_v29 = vand.u32 2147483647, %v560_v6  ;;  %v572_v33 = vand.u32 2147483648, %v560_v6  ;;  %vm566_vm9 = vweird.f32 %v560_v6 }
0x117f   :  { %2155 = vpow2.f32 %v2016_v8 }
0x1180   :  { %2157 = vpow2.f32 %v2017_v11  ;;  %vm571_vm11 = vcmp.eq.f32.partialorder %v570_v29, 8.507059e+37  ;;  %v573_v37 = vor.u32 1.1754944e-38, %v572_v33 }
0x1182   :  { %601 = vperm.xlu2 %2088, %v2413_v7   ;;  %v2564_v7 = vpop.permute.xlu1 %611 }
0x1184   :  { %v2154_v15 = vpop.eup %2153 }
0x1185   :  { %v2156_v17 = vpop.eup %2155  ;;  %v562_v20 = vmul.f32 %v2154_v15, %v560_v6  ;;  %vm567_vm8 = vweird.f32 %v2154_v15 }
0x1186   :  { %v2158_v19 = vpop.eup %2157  ;;  %v894_v21 = vadd.f32 1.0, %v2156_v17  ;;  %vm2573_vm10 = vmor %vm566_vm9, %vm567_vm8 }
0x1187   :  { %v895_v24 = vadd.f32 1.0, %v2158_v19  ;;  %v563_v25 = vsub.f32 1.0, %v562_v20 }
0x1188   :  { %2159 = vrcp.f32 %v894_v21  ;;  %vm935_vm12 = vweird.f32 %v894_v21  ;;  %v939_v40 = vand.u32 2147483647, %v894_v21  ;;  %v941_v41 = vand.u32 2147483648, %v894_v21 }
0x1189   :  { %2161 = vrcp.f32 %v895_v24  ;;  %v564_v28 = vmul.f32 %v2154_v15, %v563_v25  ;;  %vm950_vm14 = vweird.f32 %v895_v24  ;;  %v954_v47 = vand.u32 2147483647, %v895_v24 }
0x118a   :  { %616 = vperm.xlu2 %2088, %v2492_v12   ;;  %v622_v31 = vpop.permute.xlu1 %621  ;;  %2163 = vpow2.f32 %v2006_v10  ;;  %v956_v48 = vand.u32 2147483648, %v895_v24  ;;  %v942_v57 = vor.u32 1.1754944e-38, %v941_v41  ;;  %vm940_vm6 = vcmp.eq.f32.partialorder %v939_v40, 8.507059e+37 }
0x118b   :  { %v565_v32 = vadd.f32 %v2154_v15, %v564_v28  ;;  %v2571_v35 = vmul.f32 %v622_v31, %v2535_v26  ;;  %vm955_vm7 = vcmp.eq.f32.partialorder %v954_v47, 8.507059e+37 }
0x118c   :  { %v957_v58 = vor.u32 1.1754944e-38, %v956_v48 }
0x118d   :  { %v569_v43 = vsel %vm2573_vm10, %v2154_v15, %v565_v32  ;;  %v2011_v50 = vmul.f32 -1.442695, %v2571_v35 }
0x118e   :  { %v2160_v30 = vpop.eup %2159  ;;  %v2579_v46 = vsel %vm571_vm11, %v573_v37, %v569_v43 }
0x118f   :  { %v2162_v34 = vpop.eup %2161  ;;  %v931_v38 = vmul.f32 %v2160_v30, %v894_v21  ;;  %vm936_vm13 = vweird.f32 %v2160_v30  ;;  %2165 = vpow2.f32 %v2011_v50 }
0x1190   :  { %v946_v39 = vmul.f32 %v2162_v34, %v895_v24  ;;  %vm951_vm15 = vweird.f32 %v2162_v34  ;;  %vm2584_vm4 = vmor %vm935_vm12, %vm936_vm13  ;;  %v2164_v56 = vpop.eup %2163 }
0x1191   :  { %v932_v42 = vsub.f32 1.0, %v931_v38  ;;  %vm952_vm5 = vmor %vm950_vm14, %vm951_vm15  ;;  %v736_v1 = vadd.f32 1.0, %v2164_v56 }
0x1192   :  { %v947_v45 = vsub.f32 1.0, %v946_v39 }
0x1193   :  { %v933_v52 = vmul.f32 %v2160_v30, %v932_v42  ;;  %2167 = vrcp.f32 %v736_v1  ;;  %vm749_vm9 = vweird.f32 %v736_v1  ;;  %v753_v43 = vand.u32 2147483647, %v736_v1 }
0x1194   :  { %v948_v54 = vmul.f32 %v2162_v34, %v947_v45 }
0x1195   :  { %v934_v60 = vadd.f32 %v2160_v30, %v933_v52  ;;  %v2166_v6 = vpop.eup %2165  ;;  %vm754_vm14 = vcmp.eq.f32.partialorder %v753_v43, 8.507059e+37 }
0x1196   :  { %v949_v61 = vadd.f32 %v2162_v34, %v948_v54  ;;  %v2597_v11 = vadd.f32 1.0, %v2166_v6 }
0x1197   :  { %v938_v62 = vsel %vm2584_vm4, %v2160_v30, %v934_v60 }
0x1198   :  { %v953_v63 = vsel %vm952_vm5, %v2162_v34, %v949_v61  ;;  %v943_v2 = vsel %vm940_vm6, %v942_v57, %v938_v62  ;;  %v755_v34 = vand.u32 2147483648, %v736_v1  ;;  %vm824_vm5 = vweird.f32 %v2597_v11 }
0x1199   :  { %v958_v3 = vsel %vm955_vm7, %v957_v58, %v953_v63  ;;  %v2168_v16 = vpop.eup %2167  ;;  %v830_v57 = vand.u32 2147483648, %v2597_v11  ;;  %v828_v61 = vand.u32 2147483647, %v2597_v11 }
0x119a   :  { %v1021_v4 = vpack.c.bf16 %v958_v3, %v943_v2  ;;  %v745_v20 = vmul.f32 %v2168_v16, %v736_v1  ;;  %vm750_vm8 = vweird.f32 %v2168_v16  ;;  %v756_v45 = vor.u32 1.1754944e-38, %v755_v34 }
0x119b   :  { %vm751_vm11 = vmor %vm749_vm9, %vm750_vm8  ;;  %v831_v2 = vor.u32 1.1754944e-38, %v830_v57 }
0x119c   :  { %1030 = vrot.lane.b32.xlu1 %v1021_v4, %s2364_s14 }
0x11d4   :  { %v580_v26 = vpop.permute.xlu2 %579 }
0x11d5   :  { %v582_v51 = vmul.f32 %v580_v26, %v2579_v46 }
0x11d7   :  { %584 = vrot.lane.b32.xlu0 %v582_v51, %s2362_s28 }
0x11dc   :  { %v602_v0 = vpop.permute.xlu2 %601 }
0x11dd   :  { %v2592_v5 = vmul.f32 %v602_v0, %v2469_v13 }
0x11df   :  { %v2007_v8 = vmul.f32 -1.442695, %v2592_v5  ;;  %606 = vperm.xlu0 %2089, %v2459_v9   ;;  %v746_v9 = vsub.f32 1.0, %v745_v20 }
0x11e1   :  { %2169 = vpow2.f32 %v2007_v8  ;;  %v747_v28 = vmul.f32 %v2168_v16, %v746_v9  ;;  %v642_v8 = vpack.c.bf16 %v2592_v5, %v2567_v27 }
0x11e2   :  { %2171 = vrcp.f32 %v2597_v11 }
0x11e3   :  { %v748_v31 = vadd.f32 %v2168_v16, %v747_v28 }
0x11e4   :  { %v617_v15 = vpop.permute.xlu2 %616 }
0x11e5   :  { %v2600_v17 = vmul.f32 %v617_v15, %v2512_v49  ;;  %v752_v39 = vsel %vm751_vm11, %v2168_v16, %v748_v31  ;;  %vm829_vm11 = vcmp.eq.f32.partialorder %v828_v61, 8.507059e+37  ;;  %v2019_v16 = vmul.f32 -1.442695, %v2497_v14  ;;  %v2349_v15 = vld [vmem:[%s3205_s0] sm:$0xff] }
0x11e6   :  { %v757_v50 = vsel %vm754_vm14, %v756_v45, %v752_v39  ;;  %v577_v61 = vmul.f32 %v2579_v46, %v2544_v55 }
0x11e7   :  { %v2170_v13 = vpop.eup %2169  ;;  %v2010_v19 = vmul.f32 -1.442695, %v2600_v17  ;;  %626 = vperm.xlu0 %2089, %v2525_v22  }
0x11e8   :  { %v737_v21 = vadd.f32 1.0, %v2170_v13  ;;  %v2172_v24 = vpop.eup %2171  ;;  %v2014_v13 = vmul.f32 -1.442695, %v2349_v15 }
0x11e9   :  { %2173 = vpow2.f32 %v2010_v19  ;;  %v820_v10 = vmul.f32 %v2172_v24, %v2597_v11  ;;  %vm825_vm4 = vweird.f32 %v2172_v24  ;;  %v2018_v11 = vmul.f32 -1.442695, %v2492_v12  ;;  %v2350_v19 = vld [vmem:[%s3205_s0 + $0x8] sm:$0xff] }
0x11ea   :  { %2175 = vrcp.f32 %v737_v21  ;;  %v770_v36 = vand.u32 2147483648, %v737_v21  ;;  %v768_v38 = vand.u32 2147483647, %v737_v21  ;;  %vm764_vm12 = vweird.f32 %v737_v21  ;;  %vm826_vm7 = vmor %vm824_vm5, %vm825_vm4 }
0x11eb   :  { %v821_v33 = vsub.f32 1.0, %v820_v10  ;;  %v2015_v20 = vmul.f32 -1.442695, %v2350_v19 }
0x11ec   :  { %v771_v26 = vor.u32 1.1754944e-38, %v770_v36  ;;  %vm769_vm15 = vcmp.eq.f32.partialorder %v768_v38, 8.507059e+37 }
0x11ed   :  { %v822_v41 = vmul.f32 %v2172_v24, %v821_v33 }
0x11ef   :  { %v2174_v25 = vpop.eup %2173  ;;  %v823_v54 = vadd.f32 %v2172_v24, %v822_v41 }
0x11f0   :  { %v2176_v29 = vpop.eup %2175  ;;  %v740_v49 = vadd.f32 1.0, %v2174_v25 }
0x11f1   :  { %v760_v30 = vmul.f32 %v2176_v29, %v737_v21  ;;  %vm765_vm10 = vweird.f32 %v2176_v29  ;;  %v827_v63 = vsel %vm826_vm7, %v2172_v24, %v823_v54 }
0x11f2   :  { %2177 = vrcp.f32 %v740_v49  ;;  %vm766_vm13 = vmor %vm764_vm12, %vm765_vm10  ;;  %v815_v56 = vand.u32 2147483648, %v740_v49  ;;  %v813_v60 = vand.u32 2147483647, %v740_v49  ;;  %vm809_vm8 = vweird.f32 %v740_v49 }
0x11f3   :  { %v761_v32 = vsub.f32 1.0, %v760_v30  ;;  %v832_v0 = vsel %vm829_vm11, %v831_v2, %v827_v63  ;;  %2179 = vpow2.f32 %v2018_v11 }
0x11f4   :  { %v816_v1 = vor.u32 1.1754944e-38, %v815_v56  ;;  %vm814_vm10 = vcmp.eq.f32.partialorder %v813_v60, 8.507059e+37  ;;  %2181 = vpow2.f32 %v2019_v16  ;;  %v2080_v60 = vld [vmem:[%s3206_s1 + $0x38] sm:$0xff] }
0x11f5   :  { %v762_v37 = vmul.f32 %v2176_v29, %v761_v32  ;;  %2183 = vpow2.f32 %v2014_v13  ;;  %1122 = vmatpush.bf16.msrb.mxu3 %v2080_v60 }
0x11f6   :  { %2185 = vpow2.f32 %v2015_v20 }
0x11f7   :  { %v763_v40 = vadd.f32 %v2176_v29, %v762_v37 }
0x11f8   :  { %v2178_v42 = vpop.eup %2177 }
0x11f9   :  { %v767_v47 = vsel %vm766_vm13, %v2176_v29, %v763_v40  ;;  %v805_v48 = vmul.f32 %v2178_v42, %v740_v49  ;;  %vm810_vm6 = vweird.f32 %v2178_v42  ;;  %v2180_v21 = vpop.eup %2179  ;;  %v2630_v29 = vmul.f32 %v2564_v7, %v2502_v18 }
0x11fa   :  { %v772_v51 = vsel %vm769_vm15, %v771_v26, %v767_v47  ;;  %vm811_vm9 = vmor %vm809_vm8, %vm810_vm6  ;;  %v2182_v27 = vpop.eup %2181  ;;  %v896_v5 = vadd.f32 1.0, %v2180_v21 }
0x11fb   :  { %v864_v52 = vpack.c.bf16 %v772_v51, %v757_v50  ;;  %v806_v53 = vsub.f32 1.0, %v805_v48  ;;  %v897_v12 = vadd.f32 1.0, %v2182_v27  ;;  %v2184_v14 = vpop.eup %2183  ;;  %v2009_v33 = vmul.f32 -1.442695, %v2630_v29 }
0x11fc   :  { %2187 = vrcp.f32 %v896_v5  ;;  %v2186_v9 = vpop.eup %2185  ;;  %v2622_v24 = vadd.f32 1.0, %v2184_v14  ;;  %v971_v43 = vand.u32 2147483648, %v896_v5  ;;  %vm965_vm12 = vweird.f32 %v896_v5 }
0x11fd   :  { %1084 = vrot.lane.b32.xlu0 %v864_v52, %s2362_s28  ;;  %v807_v58 = vmul.f32 %v2178_v42, %v806_v53  ;;  %2189 = vrcp.f32 %v897_v12  ;;  %v2624_v25 = vadd.f32 1.0, %v2186_v9  ;;  %v986_v38 = vand.u32 2147483648, %v897_v12 }
0x11fe   :  { %2191 = vrcp.f32 %v2622_v24  ;;  %v969_v40 = vand.u32 2147483647, %v896_v5  ;;  %vm980_vm14 = vweird.f32 %v897_v12  ;;  %v972_v7 = vor.u32 1.1754944e-38, %v971_v43 }
0x11ff   :  { %v808_v62 = vadd.f32 %v2178_v42, %v807_v58  ;;  %2193 = vrcp.f32 %v2624_v25  ;;  %v987_v45 = vor.u32 1.1754944e-38, %v986_v38  ;;  %v2020_v52 = vmul.f32 -1.442695, %v2525_v22 }
0x1200   :  { %vm970_vm5 = vcmp.eq.f32.partialorder %v969_v40, 8.507059e+37  ;;  %2195 = vpow2.f32 %v2009_v33  ;;  %v2021_v58 = vmul.f32 -1.442695, %v2530_v23  ;;  %v2079_v23 = vld [vmem:[%s3206_s1 + $0x30] sm:$0xff]  ;;  %vm905_vm8 = vweird.f32 %v2622_v24  ;;  %v2077_v33 = vld [vmem:[%s3206_s1 + $0x20] sm:$0xff] }
0x1201   :  { %v812_v3 = vsel %vm811_vm9, %v2178_v42, %v808_v62  ;;  %v984_v42 = vand.u32 2147483647, %v897_v12  ;;  %2197 = vpow2.f32 %v2020_v52  ;;  %v909_v11 = vand.u32 2147483647, %v2622_v24  ;;  %1123 = vmatpush.bf16.msrb.mxu3 %v2079_v23 }
0x1202   :  { %v817_v4 = vsel %vm814_vm10, %v816_v1, %v812_v3  ;;  %v2188_v28 = vpop.eup %2187  ;;  %2199 = vpow2.f32 %v2021_v58  ;;  %vm920_vm10 = vweird.f32 %v2624_v25  ;;  %v911_v3 = vand.u32 2147483648, %v2622_v24 }
0x1203   :  { %v866_v6 = vpack.c.bf16 %v832_v0, %v817_v4  ;;  %v2190_v10 = vpop.eup %2189  ;;  %v961_v49 = vmul.f32 %v2188_v28, %v896_v5  ;;  %vm966_vm13 = vweird.f32 %v2188_v28  ;;  %vm985_vm7 = vcmp.eq.f32.partialorder %v984_v42, 8.507059e+37 }
0x1204   :  { %v976_v30 = vmul.f32 %v2190_v10, %v897_v12  ;;  %v2633_v34 = vpop.eup %2191  ;;  %vm967_vm15 = vmor %vm965_vm12, %vm966_vm13  ;;  %vm981_vm4 = vweird.f32 %v2190_v10  ;;  %v926_v4 = vand.u32 2147483648, %v2624_v25  ;;  %v924_v15 = vand.u32 2147483647, %v2624_v25 }
0x1205   :  { %1088 = vrot.lane.b32.xlu1 %v866_v6, %s2362_s28  ;;  %v962_v31 = vsub.f32 1.0, %v961_v49  ;;  %v2635_v39 = vpop.eup %2193  ;;  %vm982_vm6 = vmor %vm980_vm14, %vm981_vm4  ;;  %v901_v26 = vmul.f32 %v2633_v34, %v2622_v24  ;;  %vm906_vm9 = vweird.f32 %v2633_v34  ;;  %v912_v21 = vor.u32 1.1754944e-38, %v911_v3 }
0x1206   :  { %v977_v32 = vsub.f32 1.0, %v976_v30  ;;  %v916_v47 = vmul.f32 %v2635_v39, %v2624_v25  ;;  %v2196_v62 = vpop.eup %2195  ;;  %vm921_vm11 = vweird.f32 %v2635_v39  ;;  %vm2663_vm12 = vmor %vm905_vm8, %vm906_vm9  ;;  %v927_v27 = vor.u32 1.1754944e-38, %v926_v4 }
0x1207   :  { %v963_v36 = vmul.f32 %v2188_v28, %v962_v31  ;;  %v902_v56 = vsub.f32 1.0, %v901_v26  ;;  %v2658_v55 = vadd.f32 1.0, %v2196_v62  ;;  %v2198_v0 = vpop.eup %2197  ;;  %vm2670_vm13 = vmor %vm920_vm10, %vm921_vm11  ;;  %vm910_vm14 = vcmp.eq.f32.partialorder %v909_v11, 8.507059e+37 }
0x1208   :  { %v978_v37 = vmul.f32 %v2190_v10, %v977_v32  ;;  %v917_v57 = vsub.f32 1.0, %v916_v47  ;;  %v2200_v19 = vpop.eup %2199  ;;  %v2674_v20 = vadd.f32 1.0, %v2198_v0  ;;  %v2716_v47 = vpop.permute.xlu1 %631 }
0x1209   :  { %v964_v18 = vadd.f32 %v2188_v28, %v963_v36  ;;  %v903_v22 = vmul.f32 %v2633_v34, %v902_v56  ;;  %v2686_v25 = vadd.f32 1.0, %v2200_v19 }
0x120a   :  { %v979_v41 = vadd.f32 %v2190_v10, %v978_v37  ;;  %v918_v1 = vmul.f32 %v2635_v39, %v917_v57 }
0x120b   :  { %v968_v48 = vsel %vm967_vm15, %v2188_v28, %v964_v18  ;;  %v904_v6 = vadd.f32 %v2633_v34, %v903_v22  ;;  %vm925_vm15 = vcmp.eq.f32.partialorder %v924_v15, 8.507059e+37  ;;  %vm1010_vm9 = vweird.f32 %v2686_v25 }
0x120c   :  { %v983_v50 = vsel %vm982_vm6, %v2190_v10, %v979_v41  ;;  %v973_v51 = vsel %vm970_vm5, %v972_v7, %v968_v48  ;;  %v919_v16 = vadd.f32 %v2635_v39, %v918_v1  ;;  %v38_v7 = vld [vmem:[%s3206_s1 + $0x40] sm:$0xf]  ;;  %v800_v48 = vand.u32 2147483648, %v2658_v55 }
0x120d   :  { %651 = vrot.lane.b32.xlu1 %v642_v8, %s2362_s28  ;;  %v988_v53 = vsel %vm985_vm7, %v987_v45, %v983_v50  ;;  %v908_v12 = vsel %vm2663_vm12, %v2633_v34, %v904_v6  ;;  %v1049_v42 = vsel %vm103_vm0, %v38_v7, 0  ;;  %vm794_vm5 = vweird.f32 %v2658_v55 }
0x120e   :  { %v1022_v54 = vpack.c.bf16 %v988_v53, %v973_v51  ;;  %v923_v14 = vsel %vm2670_vm13, %v2635_v39, %v919_v16  ;;  %v913_v10 = vsel %vm910_vm14, %v912_v21, %v908_v12  ;;  %1058 = vmatpush.bf16.msrb.mxu2 %v1049_v42  ;;  %v798_v53 = vand.u32 2147483647, %v2658_v55 }
0x120f   :  { %v928_v49 = vsel %vm925_vm15, %v927_v27, %v923_v14  ;;  %vm995_vm6 = vweird.f32 %v2674_v20  ;;  %v1016_v3 = vand.u32 2147483648, %v2686_v25  ;;  %v1014_v8 = vand.u32 2147483647, %v2686_v25 }
0x1210   :  { %1032 = vrot.lane.b32.xlu0 %v1022_v54, %s2364_s14  ;;  %v1020_v31 = vpack.c.bf16 %v928_v49, %v913_v10  ;;  %v1031_v11 = vpop.permute.xlu1 %1030 }
0x1249   :  { %v585_v63 = vpop.permute.xlu0 %584 }
0x124a   :  { %v587_v2 = vadd.f32 %v585_v63, %v577_v61  ;;  %v801_v61 = vor.u32 1.1754944e-38, %v800_v48 }
0x124c   :  { %2201 = vtanh.f32 %v587_v2  ;;  %v999_v2 = vand.u32 2147483647, %v2674_v20 }
0x124d   :  { %2203 = vrcp.f32 %v2658_v55 }
0x124e   :  { %2205 = vrcp.f32 %v2674_v20 }
0x1251   :  { %v607_v5 = vpop.permute.xlu0 %606 }
0x1252   :  { %v2202_v9 = vpop.eup %2201  ;;  %v2684_v24 = vmul.f32 %v607_v5, %v2479_v44  ;;  %v2078_v44 = vld [vmem:[%s3206_s1 + $0x28] sm:$0xff]  ;;  %v1017_v5 = vor.u32 1.1754944e-38, %v1016_v3 }
0x1253   :  { %590 = vrot.lane.b32.xlu2 %v2202_v9, %s2361_s27  ;;  %v2691_v30 = vpop.eup %2203  ;;  %689 = vmatpush.bf16.msrb.mxu1 %v2078_v44 }
0x1254   :  { %v2008_v28 = vmul.f32 -1.442695, %v2684_v24  ;;  %v790_v32 = vmul.f32 %v2691_v30, %v2658_v55  ;;  %v2702_v34 = vpop.eup %2205  ;;  %vm795_vm4 = vweird.f32 %v2691_v30  ;;  %v1001_v55 = vand.u32 2147483648, %v2674_v20 }
0x1255   :  { %v991_v39 = vmul.f32 %v2702_v34, %v2674_v20  ;;  %vm996_vm7 = vweird.f32 %v2702_v34  ;;  %vm2727_vm8 = vmor %vm794_vm5, %vm795_vm4  ;;  %vm799_vm4 = vcmp.eq.f32.partialorder %v798_v53, 8.507059e+37 }
0x1256   :  { %2207 = vpow2.f32 %v2008_v28  ;;  %v791_v38 = vsub.f32 1.0, %v790_v32  ;;  %vm2737_vm12 = vmor %vm995_vm6, %vm996_vm7  ;;  %v1002_v27 = vor.u32 1.1754944e-38, %v1001_v55  ;;  %vm1000_vm6 = vcmp.eq.f32.partialorder %v999_v2, 8.507059e+37  ;;  %v2784_v2 = vld [vmem:[%s3207_s2] sm:$0xff] }
0x1257   :  { %2209 = vrcp.f32 %v2686_v25  ;;  %690 = vmatpush.bf16.msrb.mxu1 %v2077_v33  ;;  %v992_v41 = vsub.f32 1.0, %v991_v39  ;;  %vm1015_vm7 = vcmp.eq.f32.partialorder %v1014_v8, 8.507059e+37  ;;  %v2787_v55 = vperm.slane %v2784_v2, 2 }
0x1258   :  { %v792_v18 = vmul.f32 %v2691_v30, %v791_v38 }
0x1259   :  { %v627_v52 = vpop.permute.xlu0 %626  ;;  %v993_v54 = vmul.f32 %v2702_v34, %v992_v41 }
0x125a   :  { %v793_v51 = vadd.f32 %v2691_v30, %v792_v18 }
0x125b   :  { %1028 = vrot.lane.b32.xlu2 %v1020_v31, %s2364_s14  ;;  %v994_v1 = vadd.f32 %v2702_v34, %v993_v54  ;;  %v640_v31 = vmul.f32 %v627_v52, %v2548_v59 }
0x125c   :  { %v2208_v36 = vpop.eup %2207  ;;  %v797_v22 = vsel %vm2727_vm8, %v2691_v30, %v793_v51  ;;  %v643_v30 = vpack.c.bf16 %v2630_v29, %v2684_v24 }
0x125d   :  { %v2705_v43 = vpop.eup %2209  ;;  %v738_v37 = vadd.f32 1.0, %v2208_v36  ;;  %v802_v13 = vsel %vm799_vm4, %v801_v61, %v797_v22  ;;  %v998_v21 = vsel %vm2737_vm12, %v2702_v34, %v994_v1  ;;  %v2012_v44 = vmul.f32 -1.442695, %v640_v31 }
0x125e   :  { %v1006_v40 = vmul.f32 %v2705_v43, %v2686_v25  ;;  %vm1011_vm10 = vweird.f32 %v2705_v43  ;;  %v1003_v9 = vsel %vm1000_vm6, %v1002_v27, %v998_v21  ;;  %v644_v1 = vpack.c.bf16 %v2571_v35, %v2600_v17 }
0x125f   :  { %2211 = vrcp.f32 %v738_v37  ;;  %v785_v58 = vand.u32 2147483648, %v738_v37  ;;  %v783_v63 = vand.u32 2147483647, %v738_v37  ;;  %vm779_vm13 = vweird.f32 %v738_v37  ;;  %vm2745_vm14 = vmor %vm1010_vm9, %vm1011_vm10 }
0x1260   :  { %v1007_v45 = vsub.f32 1.0, %v1006_v40  ;;  %2213 = vpow2.f32 %v2012_v44 }
0x1261   :  { %v786_v16 = vor.u32 1.1754944e-38, %v785_v58  ;;  %vm784_vm5 = vcmp.eq.f32.partialorder %v783_v63, 8.507059e+37 }
0x1262   :  { %v1008_v57 = vmul.f32 %v2705_v43, %v1007_v45 }
0x1264   :  { %v1009_v0 = vadd.f32 %v2705_v43, %v1008_v57 }
0x1265   :  { %v2212_v26 = vpop.eup %2211 }
0x1266   :  { %v775_v50 = vmul.f32 %v2212_v26, %v738_v37  ;;  %vm780_vm11 = vweird.f32 %v2212_v26  ;;  %v1013_v14 = vsel %vm2745_vm14, %v2705_v43, %v1009_v0  ;;  %v2214_v32 = vpop.eup %2213  ;;  %v39_v0 = vld [vmem:[%s3206_s1 + $0x48] sm:$0xf] }
0x1267   :  { %vm781_vm15 = vmor %vm779_vm13, %vm780_vm11  ;;  %v1018_v25 = vsel %vm1015_vm7, %v1017_v5, %v1013_v14  ;;  %v742_v33 = vadd.f32 1.0, %v2214_v32  ;;  %v1324_v6 = vsel %vm103_vm0, %v39_v0, 0 }
0x1268   :  { %v776_v56 = vsub.f32 1.0, %v775_v50  ;;  %v1023_v28 = vpack.c.bf16 %v1018_v25, %v1003_v9  ;;  %1333 = vmatpush.bf16.msrb.mxu0 %v1324_v6 }
0x1269   :  { %2215 = vrcp.f32 %v742_v33  ;;  %vm839_vm9 = vweird.f32 %v742_v33  ;;  %v843_v48 = vand.u32 2147483647, %v742_v33 }
0x126a   :  { %v777_v62 = vmul.f32 %v2212_v26, %v776_v56 }
0x126b   :  { %vm844_vm14 = vcmp.eq.f32.partialorder %v843_v48, 8.507059e+37 }
0x126c   :  { %v778_v4 = vadd.f32 %v2212_v26, %v777_v62 }
0x126e   :  { %v782_v15 = vsel %vm781_vm15, %v2212_v26, %v778_v4  ;;  %v845_v26 = vand.u32 2147483648, %v742_v33 }
0x126f   :  { %v1085_v19 = vpop.permute.xlu0 %1084  ;;  %v787_v20 = vsel %vm784_vm5, %v786_v16, %v782_v15  ;;  %v2216_v24 = vpop.eup %2215 }
0x1270   :  { %2034 = vmatmul.msk.bf16.vlgmr.msrb.gmra.mxu3 %vm133_vm3, %v1085_v19  ;;  %v865_v12 = vpack.c.bf16 %v802_v13, %v787_v20  ;;  %v835_v39 = vmul.f32 %v2216_v24, %v742_v33  ;;  %vm840_vm8 = vweird.f32 %v2216_v24  ;;  %v846_v54 = vor.u32 1.1754944e-38, %v845_v26 }
0x1271   :  { %vm841_vm11 = vmor %vm839_vm9, %vm840_vm8 }
0x1272   :  { %1086 = vrot.lane.b32.xlu2 %v865_v12, %s2362_s28  ;;  %v836_v18 = vsub.f32 1.0, %v835_v39 }
0x1274   :  { %v837_v7 = vmul.f32 %v2216_v24, %v836_v18 }
0x1276   :  { %v838_v42 = vadd.f32 %v2216_v24, %v837_v7 }
0x1277   :  { %v2758_v10 = vpop.permute.xlu1 %1088 }
0x1278   :  { %v842_v52 = vsel %vm841_vm11, %v2216_v24, %v838_v42 }
0x1279   :  { %v847_v60 = vsel %vm844_vm14, %v846_v54, %v842_v52 }
0x127a   :  { %1034 = vrot.lane.b32.xlu2 %v1023_v28, %s2364_s14 }
0x127f   :  { %v652_v49 = vpop.permute.xlu1 %651 }
0x1280   :  { %2002 = vmatmul.msk.bf16.vlgmr.msrb.gmra.mxu1 %vm133_vm3, %v652_v49 }
0x1282   :  { %653 = vrot.lane.b32.xlu2 %v643_v30, %s2362_s28  ;;  %v1033_v63 = vpop.permute.xlu0 %1032 }
0x12ad   :  { %v591_v34 = vpop.permute.xlu2 %590 }
0x12ae   :  { %v593_v36 = vmul.f32 %v591_v34, %v2579_v46 }
0x12b0   :  { %v641_v43 = vmul.f32 %v2716_v47, %v593_v36 }
0x12b2   :  { %v2013_v37 = vmul.f32 -1.442695, %v641_v43  ;;  %v645_v38 = vpack.c.bf16 %v641_v43, %v640_v31 }
0x12b4   :  { %2217 = vpow2.f32 %v2013_v37  ;;  %657 = vrot.lane.b32.xlu1 %v645_v38, %s2362_s28 }
0x12b5   :  { %v1029_v29 = vpop.permute.xlu2 %1028 }
0x12b6   :  { %2022 = vmatmul.msk.bf16.vlgmr.msrb.gmra.mxu2 %vm99_vm1, %v1029_v29 }
0x12ba   :  { %v2218_v59 = vpop.eup %2217 }
0x12bb   :  { %v743_v40 = vadd.f32 1.0, %v2218_v59 }
0x12bd   :  { %2219 = vrcp.f32 %v743_v40  ;;  %v860_v47 = vand.u32 2147483648, %v743_v40  ;;  %v858_v51 = vand.u32 2147483647, %v743_v40  ;;  %vm854_vm12 = vweird.f32 %v743_v40 }
0x12bf   :  { %v861_v56 = vor.u32 1.1754944e-38, %v860_v47  ;;  %vm859_vm15 = vcmp.eq.f32.partialorder %v858_v51, 8.507059e+37 }
0x12c3   :  { %v2220_v41 = vpop.eup %2219 }
0x12c4   :  { %v850_v46 = vmul.f32 %v2220_v41, %v743_v40  ;;  %vm855_vm10 = vweird.f32 %v2220_v41 }
0x12c5   :  { %vm856_vm13 = vmor %vm854_vm12, %vm855_vm10 }
0x12c6   :  { %2023 = vmatmul.msk.bf16.gmra.mxu2 %vm99_vm1, %v1031_v11  ;;  %v851_v45 = vsub.f32 1.0, %v850_v46  ;;  %v2804_v11 = vperm.slane %v2784_v2, 3 }
0x12c8   :  { %v852_v50 = vmul.f32 %v2220_v41, %v851_v45 }
0x12ca   :  { %v853_v53 = vadd.f32 %v2220_v41, %v852_v50 }
0x12cc   :  { %v1087_v57 = vpop.permute.xlu2 %1086  ;;  %v857_v58 = vsel %vm856_vm13, %v2220_v41, %v853_v53 }
0x12cd   :  { %2035 = vmatmul.msk.bf16.gmra.mxu3 %vm133_vm3, %v1087_v57  ;;  %v862_v61 = vsel %vm859_vm15, %v861_v56, %v857_v58 }
0x12ce   :  { %v867_v62 = vpack.c.bf16 %v862_v61, %v847_v60 }
0x12d0   :  { %1090 = vrot.lane.b32.xlu0 %v867_v62, %s2362_s28 }
0x12d4   :  { %v1035_v22 = vpop.permute.xlu2 %1034 }
0x12d6   :  { %2024 = vmatmul.msk.bf16.gmra.mxu2 %vm99_vm1, %v1033_v63 }
0x12d8   :  { %655 = vrot.lane.b32.xlu0 %v644_v1, %s2362_s28 }
0x12dc   :  { %v654_v23 = vpop.permute.xlu2 %653 }
0x12dd   :  { %2003 = vmatmul.msk.bf16.gmra.mxu1 %vm133_vm3, %v654_v23  ;;  %2036 = vmatmul.msk.bf16.gmra.mxu3 %vm133_vm3, %v2758_v10 }
0x12e6   :  { %2025 = vmatmul.msk.bf16.gmra.mxu2 %vm99_vm1, %v1035_v22 }
0x12f3   :  { %v1125_v8 = vpop.f32.mrf.mxu3 }
0x12fb   :  { %v1127_v20 = vpop.f32.mrf.mxu3 }
0x12fd   :  { %v692_v35 = vpop.f32.mrf.mxu1 }
0x12fe   :  { %v693_v17 = vadd.f32 %v692_v35, %v2787_v55 }
0x1300   :  { %1908 = vst.msk [vmem:[%s3208_s3] sm:$0xff] %vm99_vm1, %v693_v17 }
0x1305   :  { %v694_v3 = vpop.f32.mrf.mxu1 }
0x1306   :  { %v695_v4 = vadd.f32 %v694_v3, %v2787_v55 }
0x1308   :  { %1909 = vst.msk [vmem:[%s3208_s3 + $0x8] sm:$0xff] %vm99_vm1, %v695_v4 }
0x1326   :  { %v658_v40 = vpop.permute.xlu1 %657 }
0x1339   :  { %v1060_v16 = vpop.f32.mrf.mxu2 }
0x133a   :  { %v1126_v15 = vadd.f32 %v1125_v8, %v1060_v16 }
0x133c   :  { %v1146_v13 = vadd.f32 %v2804_v11, %v1126_v15 }
0x133e   :  { %v2038_v19 = vmul.f32 -1.442695, %v1146_v13 }
0x1340   :  { %2221 = vpow2.f32 %v2038_v19 }
0x1341   :  { %v1062_v21 = vpop.f32.mrf.mxu2 }
0x1342   :  { %v1128_v27 = vadd.f32 %v1127_v20, %v1062_v21  ;;  %v1091_v5 = vpop.permute.xlu0 %1090 }
0x1343   :  { %2037 = vmatmul.msk.bf16.gmra.mxu3 %vm133_vm3, %v1091_v5 }
0x1344   :  { %v1147_v12 = vadd.f32 %v2804_v11, %v1128_v27 }
0x1346   :  { %v2222_v14 = vpop.eup %2221  ;;  %v2039_v9 = vmul.f32 -1.442695, %v1147_v12 }
0x1347   :  { %v1178_v25 = vadd.f32 1.0, %v2222_v14 }
0x1348   :  { %2223 = vpow2.f32 %v2039_v9 }
0x1349   :  { %2225 = vrcp.f32 %v1178_v25  ;;  %v1065_v28 = vpop.f32.mrf.mxu2  ;;  %vm1191_vm0 = vweird.f32 %v1178_v25  ;;  %v1197_v45 = vand.u32 2147483648, %v1178_v25  ;;  %v1195_v47 = vand.u32 2147483647, %v1178_v25 }
0x134a   :  { %v656_v10 = vpop.permute.xlu0 %655 }
0x134b   :  { %2004 = vmatmul.msk.bf16.gmra.mxu1 %vm133_vm3, %v656_v10  ;;  %v1198_v60 = vor.u32 1.1754944e-38, %v1197_v45  ;;  %vm1196_vm8 = vcmp.eq.f32.partialorder %v1195_v47, 8.507059e+37 }
0x134e   :  { %v2224_v49 = vpop.eup %2223 }
0x134f   :  { %v2226_v30 = vpop.eup %2225  ;;  %v1179_v31 = vadd.f32 1.0, %v2224_v49 }
0x1350   :  { %v1187_v44 = vmul.f32 %v2226_v30, %v1178_v25  ;;  %v1130_v32 = vpop.f32.mrf.mxu3  ;;  %vm1192_vm4 = vweird.f32 %v2226_v30 }
0x1351   :  { %2227 = vrcp.f32 %v1179_v31  ;;  %v1131_v33 = vadd.f32 %v1130_v32, %v1065_v28  ;;  %v1067_v43 = vpop.f32.mrf.mxu2  ;;  %v1212_v26 = vand.u32 2147483648, %v1179_v31  ;;  %v1210_v50 = vand.u32 2147483647, %v1179_v31  ;;  %vm2818_vm6 = vmor %vm1191_vm0, %vm1192_vm4 }
0x1352   :  { %v1188_v34 = vsub.f32 1.0, %v1187_v44 }
0x1353   :  { %v1148_v36 = vadd.f32 %v2804_v11, %v1131_v33  ;;  %v1213_v61 = vor.u32 1.1754944e-38, %v1212_v26  ;;  %vm1211_vm9 = vcmp.eq.f32.partialorder %v1210_v50, 8.507059e+37 }
0x1354   :  { %v1189_v38 = vmul.f32 %v2226_v30, %v1188_v34 }
0x1355   :  { %v2040_v37 = vmul.f32 -1.442695, %v1148_v36 }
0x1356   :  { %v1190_v41 = vadd.f32 %v2226_v30, %v1189_v38 }
0x1357   :  { %v2228_v29 = vpop.eup %2227  ;;  %2229 = vpow2.f32 %v2040_v37 }
0x1358   :  { %v1202_v24 = vmul.f32 %v2228_v29, %v1179_v31  ;;  %v1132_v59 = vpop.f32.mrf.mxu3  ;;  %vm1207_vm5 = vweird.f32 %v2228_v29  ;;  %v1194_v57 = vsel %vm2818_vm6, %v2226_v30, %v1190_v41 }
0x1359   :  { %v1133_v39 = vadd.f32 %v1132_v59, %v1067_v43  ;;  %v1070_v56 = vpop.f32.mrf.mxu2  ;;  %v1199_v1 = vsel %vm1196_vm8, %v1198_v60, %v1194_v57 }
0x135a   :  { %v1203_v18 = vsub.f32 1.0, %v1202_v24  ;;  %v697_v7 = vpop.f32.mrf.mxu1 }
0x135b   :  { %v1149_v46 = vadd.f32 %v2804_v11, %v1133_v39  ;;  %v698_v42 = vadd.f32 %v697_v7, %v2787_v55  ;;  %2005 = vmatmul.msk.bf16.gmra.mxu1 %vm133_vm3, %v658_v40  ;;  %vm1206_vm3 = vweird.f32 %v1179_v31 }
0x135c   :  { %v1204_v48 = vmul.f32 %v2228_v29, %v1203_v18  ;;  %vm1208_vm7 = vmor %vm1206_vm3, %vm1207_vm5 }
0x135d   :  { %v2230_v51 = vpop.eup %2229  ;;  %v2041_v52 = vmul.f32 -1.442695, %v1149_v46  ;;  %1910 = vst.msk [vmem:[%s3208_s3 + $0x10] sm:$0xff] %vm99_vm1, %v698_v42 }
0x135e   :  { %v2822_v54 = vadd.f32 1.0, %v2230_v51  ;;  %v1205_v58 = vadd.f32 %v2228_v29, %v1204_v48 }
0x135f   :  { %2231 = vpow2.f32 %v2041_v52 }
0x1360   :  { %2233 = vrcp.f32 %v2822_v54  ;;  %v1135_v62 = vpop.f32.mrf.mxu3  ;;  %v1209_v63 = vsel %vm1208_vm7, %v2228_v29, %v1205_v58  ;;  %vm1221_vm11 = vweird.f32 %v2822_v54  ;;  %v1227_v30 = vand.u32 2147483648, %v2822_v54 }
0x1361   :  { %v1136_v22 = vadd.f32 %v1135_v62, %v1070_v56  ;;  %v1214_v23 = vsel %vm1211_vm9, %v1213_v61, %v1209_v63  ;;  %v1072_v13 = vpop.f32.mrf.mxu2  ;;  %v1225_v44 = vand.u32 2147483647, %v2822_v54 }
0x1362   :  { %v699_v35 = vpop.f32.mrf.mxu1  ;;  %v1306_v17 = vpack.c.bf16 %v1214_v23, %v1199_v1  ;;  %v1228_v24 = vor.u32 1.1754944e-38, %v1227_v30 }
0x1363   :  { %v1150_v3 = vadd.f32 %v2804_v11, %v1136_v22  ;;  %v700_v4 = vadd.f32 %v699_v35, %v2787_v55  ;;  %vm1226_vm0 = vcmp.eq.f32.partialorder %v1225_v44, 8.507059e+37 }
0x1364   :  { %2046 = vmatmul.msk.bf16.vlgmr.msrb.gmra.mxu0 %vm99_vm1, %v1306_v17 }
0x1365   :  { %v2232_v0 = vpop.eup %2231  ;;  %v2042_v6 = vmul.f32 -1.442695, %v1150_v3  ;;  %1911 = vst.msk [vmem:[%s3208_s3 + $0x18] sm:$0xff] %vm99_vm1, %v700_v4 }
0x1366   :  { %v2234_v8 = vpop.eup %2233  ;;  %v1181_v16 = vadd.f32 1.0, %v2232_v0 }
0x1367   :  { %2235 = vpow2.f32 %v2042_v6  ;;  %v1217_v15 = vmul.f32 %v2234_v8, %v2822_v54  ;;  %vm1222_vm10 = vweird.f32 %v2234_v8 }
0x1368   :  { %2237 = vrcp.f32 %v1181_v16  ;;  %v1137_v19 = vpop.f32.mrf.mxu3  ;;  %v1242_v31 = vand.u32 2147483648, %v1181_v16  ;;  %v1240_v33 = vand.u32 2147483647, %v1181_v16  ;;  %vm2839_vm13 = vmor %vm1221_vm11, %vm1222_vm10  ;;  %vm1236_vm14 = vweird.f32 %v1181_v16 }
0x1369   :  { %v1138_v20 = vadd.f32 %v1137_v19, %v1072_v13  ;;  %v1218_v21 = vsub.f32 1.0, %v1217_v15  ;;  %v1075_v1 = vpop.f32.mrf.mxu2 }
0x136a   :  { %v1243_v59 = vor.u32 1.1754944e-38, %v1242_v31  ;;  %vm1241_vm4 = vcmp.eq.f32.partialorder %v1240_v33, 8.507059e+37 }
0x136b   :  { %v1151_v27 = vadd.f32 %v2804_v11, %v1138_v20  ;;  %v1219_v14 = vmul.f32 %v2234_v8, %v1218_v21 }
0x136d   :  { %v2236_v5 = vpop.eup %2235  ;;  %v2043_v12 = vmul.f32 -1.442695, %v1151_v27  ;;  %v1220_v10 = vadd.f32 %v2234_v8, %v1219_v14 }
0x136e   :  { %v2238_v9 = vpop.eup %2237  ;;  %v1182_v25 = vadd.f32 1.0, %v2236_v5 }
0x136f   :  { %2239 = vpow2.f32 %v2043_v12  ;;  %v1232_v28 = vmul.f32 %v2238_v9, %v1181_v16  ;;  %vm1237_vm12 = vweird.f32 %v2238_v9  ;;  %v1224_v43 = vsel %vm2839_vm13, %v2234_v8, %v1220_v10 }
0x1370   :  { %2241 = vrcp.f32 %v1182_v25  ;;  %vm1238_vm15 = vmor %vm1236_vm14, %vm1237_vm12  ;;  %v1229_v18 = vsel %vm1226_vm0, %v1228_v24, %v1224_v43  ;;  %vm1251_vm6 = vweird.f32 %v1182_v25  ;;  %v1257_v50 = vand.u32 2147483648, %v1182_v25 }
0x1371   :  { %v1233_v49 = vsub.f32 1.0, %v1232_v28  ;;  %v1255_v52 = vand.u32 2147483647, %v1182_v25  ;;  %v1077_v6 = vpop.f32.mrf.mxu2  ;;  %v2865_v28 = vperm.slane %v2784_v2, 4  ;;  %vm1371_vm12 = vcmask 392448  }
0x1372   :  { %v1258_v58 = vor.u32 1.1754944e-38, %v1257_v50 }
0x1373   :  { %v1234_v32 = vmul.f32 %v2238_v9, %v1233_v49  ;;  %vm1256_vm10 = vcmp.eq.f32.partialorder %v1255_v52, 8.507059e+37 }
0x1375   :  { %v2240_v36 = vpop.eup %2239  ;;  %v1235_v37 = vadd.f32 %v2238_v9, %v1234_v32 }
0x1376   :  { %v2242_v38 = vpop.eup %2241  ;;  %v1183_v29 = vadd.f32 1.0, %v2240_v36 }
0x1377   :  { %v1239_v39 = vsel %vm1238_vm15, %v2238_v9, %v1235_v37  ;;  %v1247_v40 = vmul.f32 %v2242_v38, %v1182_v25  ;;  %vm1252_vm5 = vweird.f32 %v2242_v38 }
0x1378   :  { %2243 = vrcp.f32 %v1183_v29  ;;  %v1244_v7 = vsel %vm1241_vm4, %v1243_v59, %v1239_v39  ;;  %v1272_v51 = vand.u32 2147483648, %v1183_v29  ;;  %v1270_v54 = vand.u32 2147483647, %v1183_v29  ;;  %vm1253_vm7 = vmor %vm1251_vm6, %vm1252_vm5 }
0x1379   :  { %v1307_v41 = vpack.c.bf16 %v1244_v7, %v1229_v18  ;;  %v1248_v46 = vsub.f32 1.0, %v1247_v40  ;;  %vm1266_vm8 = vweird.f32 %v1183_v29 }
0x137a   :  { %v1273_v60 = vor.u32 1.1754944e-38, %v1272_v51  ;;  %vm1271_vm11 = vcmp.eq.f32.partialorder %v1270_v54, 8.507059e+37 }
0x137b   :  { %2047 = vmatmul.msk.bf16.gmra.mxu0 %vm99_vm1, %v1307_v41  ;;  %v1249_v42 = vmul.f32 %v2242_v38, %v1248_v46 }
0x137d   :  { %v1250_v47 = vadd.f32 %v2242_v38, %v1249_v42 }
0x137e   :  { %v2244_v45 = vpop.eup %2243 }
0x137f   :  { %v1262_v26 = vmul.f32 %v2244_v45, %v1183_v29  ;;  %vm1267_vm3 = vweird.f32 %v2244_v45  ;;  %v1254_v56 = vsel %vm1253_vm7, %v2242_v38, %v1250_v47 }
0x1380   :  { %vm1268_vm9 = vmor %vm1266_vm8, %vm1267_vm3  ;;  %v1259_v62 = vsel %vm1256_vm10, %v1258_v58, %v1254_v56 }
0x1381   :  { %v1263_v48 = vsub.f32 1.0, %v1262_v26 }
0x1383   :  { %v1264_v53 = vmul.f32 %v2244_v45, %v1263_v48 }
0x1385   :  { %v1265_v57 = vadd.f32 %v2244_v45, %v1264_v53 }
0x1387   :  { %v1269_v61 = vsel %vm1268_vm9, %v2244_v45, %v1265_v57 }
0x1388   :  { %v1274_v63 = vsel %vm1271_vm11, %v1273_v60, %v1269_v61 }
0x1389   :  { %v1308_v22 = vpack.c.bf16 %v1274_v63, %v1259_v62 }
0x138b   :  { %2048 = vmatmul.msk.bf16.gmra.mxu0 %vm99_vm1, %v1308_v22 }
0x13c6   :  { %v1140_v23 = vpop.f32.mrf.mxu3 }
0x13c7   :  { %v1141_v35 = vadd.f32 %v1140_v23, %v1075_v1 }
0x13c8   :  { %v702_v17 = vpop.f32.mrf.mxu1 }
0x13c9   :  { %v1152_v3 = vadd.f32 %v2804_v11, %v1141_v35  ;;  %v703_v4 = vadd.f32 %v702_v17, %v2787_v55 }
0x13cb   :  { %v2044_v0 = vmul.f32 -1.442695, %v1152_v3  ;;  %1912 = vst.msk [vmem:[%s3208_s3 + $0x20] sm:$0xff] %vm99_vm1, %v703_v4  ;;  %v2365_v4 = vmov 24  }
0x13cc   :  { %2090 = vset.pattern.permute.xlu2 %v2365_v4  ;;  %2091 = vset.pattern.permute.xlu1 %v2365_v4 }
0x13cd   :  { %2245 = vpow2.f32 %v2044_v0  ;;  %2092 = vset.pattern.permute.xlu0 %v2365_v4  ;;  %v2352_v0 = vld [vmem:[%s3205_s0] sm:$0xff] }
0x13ce   :  { %v1142_v8 = vpop.f32.mrf.mxu3 }
0x13cf   :  { %v1143_v16 = vadd.f32 %v1142_v8, %v1077_v6  ;;  %v1508_v6 = vmax.f32 %v2352_v0, 1e-10 }
0x13d0   :  { %v704_v15 = vpop.f32.mrf.mxu1 }
0x13d1   :  { %v1153_v13 = vadd.f32 %v2804_v11, %v1143_v16  ;;  %v705_v19 = vadd.f32 %v704_v15, %v2787_v55 }
0x13d3   :  { %v2246_v20 = vpop.eup %2245  ;;  %v2045_v21 = vmul.f32 -1.442695, %v1153_v13  ;;  %1913 = vst.msk [vmem:[%s3208_s3 + $0x28] sm:$0xff] %vm99_vm1, %v705_v19  ;;  %v2353_v19 = vld [vmem:[%s3205_s0 + $0x10] sm:$0xff] }
0x13d4   :  { %v1184_v27 = vadd.f32 1.0, %v2246_v20  ;;  %v1510_v20 = vmax.f32 %v2353_v19, 1e-10 }
0x13d5   :  { %2247 = vpow2.f32 %v2045_v21 }
0x13d6   :  { %2249 = vrcp.f32 %v1184_v27  ;;  %vm1281_vm14 = vweird.f32 %v1184_v27  ;;  %v1287_v43 = vand.u32 2147483648, %v1184_v27  ;;  %v1285_v29 = vand.u32 2147483647, %v1184_v27 }
0x13d8   :  { %v707_v5 = vpop.f32.mrf.mxu1  ;;  %v1288_v41 = vor.u32 1.1754944e-38, %v1287_v43  ;;  %vm1286_vm6 = vcmp.eq.f32.partialorder %v1285_v29, 8.507059e+37  ;;  %v2356_v43 = vld [vmem:[%s3205_s0 + $0x30] sm:$0xff]  ;;  %v2357_v29 = vld [vmem:[%s3205_s0 + $0x18] sm:$0xff] }
0x13d9   :  { %v708_v12 = vadd.f32 %v707_v5, %v2787_v55 }
0x13db   :  { %v2248_v14 = vpop.eup %2247  ;;  %1914 = vst.msk [vmem:[%s3208_s3 + $0x30] sm:$0xff] %vm99_vm1, %v708_v12 }
0x13dc   :  { %v2250_v11 = vpop.eup %2249  ;;  %v1185_v9 = vadd.f32 1.0, %v2248_v14 }
0x13dd   :  { %v1277_v25 = vmul.f32 %v2250_v11, %v1184_v27  ;;  %vm1282_vm13 = vweird.f32 %v2250_v11 }
0x13de   :  { %2251 = vrcp.f32 %v1185_v9  ;;  %v1302_v37 = vand.u32 2147483648, %v1185_v9  ;;  %v1300_v59 = vand.u32 2147483647, %v1185_v9  ;;  %vm1283_vm0 = vmor %vm1281_vm14, %vm1282_vm13  ;;  %vm1296_vm4 = vweird.f32 %v1185_v9 }
0x13df   :  { %v1278_v10 = vsub.f32 1.0, %v1277_v25 }
0x13e0   :  { %v709_v49 = vpop.f32.mrf.mxu1  ;;  %v1303_v46 = vor.u32 1.1754944e-38, %v1302_v37  ;;  %vm1301_vm3 = vcmp.eq.f32.partialorder %v1300_v59, 8.507059e+37  ;;  %v1514_v37 = vmax.f32 %v2356_v43, 1e-10 }
0x13e1   :  { %v710_v30 = vadd.f32 %v709_v49, %v2787_v55  ;;  %v1335_v31 = vpop.f32.mrf.mxu0  ;;  %v1279_v32 = vmul.f32 %v2250_v11, %v1278_v10  ;;  %v2355_v49 = vld [vmem:[%s3205_s0 + $0x8] sm:$0xff] }
0x13e2   :  { %v2869_v44 = vadd.f32 %v1335_v31, %v2865_v28 }
0x13e3   :  { %1915 = vst.msk [vmem:[%s3208_s3 + $0x38] sm:$0xff] %vm99_vm1, %v710_v30  ;;  %v1280_v36 = vadd.f32 %v2250_v11, %v1279_v32  ;;  %v1509_v30 = vmax.f32 %v2355_v49, 1e-10 }
0x13e4   :  { %v2252_v33 = vpop.eup %2251  ;;  %v1372_v2 = vsel %vm1371_vm12, %v2869_v44, -inf }
0x13e5   :  { %1373 = vmax.xlane.f32.xlu2 %v1372_v2  ;;  %v1292_v34 = vmul.f32 %v2252_v33, %v1185_v9  ;;  %vm1297_vm15 = vweird.f32 %v2252_v33  ;;  %v1284_v40 = vsel %vm1283_vm0, %v2250_v11, %v1280_v36  ;;  %v2354_v9 = vld [vmem:[%s3205_s0 + $0x20] sm:$0xff] }
0x13e6   :  { %vm1298_vm5 = vmor %vm1296_vm4, %vm1297_vm15  ;;  %v1289_v45 = vsel %vm1286_vm6, %v1288_v41, %v1284_v40  ;;  %v1512_v25 = vmax.f32 %v2354_v9, 1e-10 }
0x13e7   :  { %v1293_v55 = vsub.f32 1.0, %v1292_v34 }
0x13e9   :  { %v1337_v38 = vpop.f32.mrf.mxu0  ;;  %v1294_v24 = vmul.f32 %v2252_v33, %v1293_v55 }
0x13ea   :  { %v2878_v39 = vadd.f32 %v1337_v38, %v2865_v28 }
0x13eb   :  { %v1295_v18 = vadd.f32 %v2252_v33, %v1294_v24  ;;  %v1511_v24 = vmax.f32 %v2357_v29, 1e-10 }
0x13ec   :  { %v1375_v7 = vsel %vm1371_vm12, %v2878_v39, -inf }
0x13ed   :  { %1376 = vmax.xlane.f32.xlu0 %v1375_v7  ;;  %v1299_v42 = vsel %vm1298_vm5, %v2252_v33, %v1295_v18 }
0x13ee   :  { %v1304_v26 = vsel %vm1301_vm3, %v1303_v46, %v1299_v42 }
0x13ef   :  { %v1309_v47 = vpack.c.bf16 %v1304_v26, %v1289_v45 }
0x13f1   :  { %2049 = vmatmul.msk.bf16.gmra.mxu0 %vm99_vm1, %v1309_v47  ;;  %vm1948_vm1 = vcmask 72768  }
0x13f8   :  { %v1340_v48 = vpop.f32.mrf.mxu0 }
0x13f9   :  { %v2884_v50 = vadd.f32 %v1340_v48, %v2865_v28 }
0x13fb   :  { %v1378_v51 = vsel %vm1371_vm12, %v2884_v50, -inf  ;;  %v1357_v40 = vmax.f32 %v2884_v50, -5.0 }
0x13fc   :  { %1379 = vmax.xlane.f32.xlu1 %v1378_v51  ;;  %v1355_v51 = vmax.f32 %v2869_v44, -5.0 }
0x13fd   :  { %v2956_v42 = vmin.f32 %v1357_v40, 3.0 }
0x1400   :  { %v1342_v52 = vpop.f32.mrf.mxu0 }
0x1401   :  { %v2889_v53 = vadd.f32 %v1342_v52, %v2865_v28 }
0x1403   :  { %v1381_v54 = vsel %vm1371_vm12, %v2889_v53, -inf }
0x1404   :  { %1382 = vmax.xlane.f32.xlu2 %v1381_v54  ;;  %v2358_v54 = vld [vmem:[%s3205_s0 + $0x28] sm:$0xff] }
0x1408   :  { %v1345_v56 = vpop.f32.mrf.mxu0 }
0x1409   :  { %v2894_v57 = vadd.f32 %v1345_v56, %v2865_v28  ;;  %v1513_v56 = vmax.f32 %v2358_v54, 1e-10 }
0x140b   :  { %v1384_v58 = vsel %vm1371_vm12, %v2894_v57, -inf }
0x140c   :  { %1385 = vmax.xlane.f32.xlu2 %v1384_v58 }
0x1410   :  { %v1347_v60 = vpop.f32.mrf.mxu0 }
0x1411   :  { %v2899_v61 = vadd.f32 %v1347_v60, %v2865_v28  ;;  %v1550_v60 = vsub.f32 0.0, %v2956_v42 }
0x1413   :  { %v1387_v62 = vsel %vm1371_vm12, %v2899_v61, -inf  ;;  %v1560_v4 = vmul.f32 1.442695, %v1550_v60 }
0x1414   :  { %1388 = vmax.xlane.f32.xlu0 %v1387_v62 }
0x1458   :  { %v2903_v63 = vpop.xlane.xlu2 %1373 }
0x1459   :  { %v1396_v22 = vsub.f32 %v2869_v44, %v2903_v63 }
0x145b   :  { %v1404_v1 = vmul.f32 1.442695, %v1396_v22 }
0x145d   :  { %2253 = vpow2.f32 %v1404_v1  ;;  %v2970_v1 = vmin.f32 %v1355_v51, 3.0 }
0x1460   :  { %v2907_v23 = vpop.xlane.xlu0 %1376 }
0x1461   :  { %v1397_v35 = vsub.f32 %v2878_v39, %v2907_v23 }
0x1463   :  { %v2254_v17 = vpop.eup %2253  ;;  %v1406_v3 = vmul.f32 1.442695, %v1397_v35 }
0x1464   :  { %1428 = vrot.lane.b32.xlu0 %v2254_v17, %s2360_s16 }
0x1465   :  { %2255 = vpow2.f32 %v1406_v3 }
0x1466   :  { %2257 = vlog2.f32 %v1508_v6 }
0x146b   :  { %v2256_v8 = vpop.eup %2255 }
0x146c   :  { %1430 = vrot.lane.b32.xlu1 %v2256_v8, %s2360_s16  ;;  %v2258_v21 = vpop.eup %2257  ;;  %v1358_v8 = vmax.f32 %v2889_v53, -5.0 }
0x146d   :  { %v2925_v5 = vmul.f32 0.6931472, %v2258_v21 }
0x146f   :  { %v2916_v16 = vpop.xlane.xlu1 %1379  ;;  %v2050_v10 = vadd.f32 -0.3, %v2925_v5 }
0x1470   :  { %v1398_v15 = vsub.f32 %v2884_v50, %v2916_v16 }
0x1471   :  { %v1540_v33 = vmul.f32 0.5882353, %v2050_v10 }
0x1472   :  { %v1408_v13 = vmul.f32 1.442695, %v1398_v15 }
0x1474   :  { %2259 = vpow2.f32 %v1408_v13  ;;  %v2359_v13 = vld [vmem:[%s3205_s0 + $0x38] sm:$0xff] }
0x1475   :  { %2261 = vlog2.f32 %v1510_v20  ;;  %v1515_v19 = vmax.f32 %v2359_v13, 1e-10  ;;  %v1548_v20 = vsub.f32 0.0, %v2970_v1  ;;  %v1350_v13 = vpop.f32.mrf.mxu0 }
0x1477   :  { %v2923_v27 = vpop.xlane.xlu2 %1382  ;;  %v1556_v10 = vmul.f32 1.442695, %v1548_v20 }
0x1478   :  { %v1399_v12 = vsub.f32 %v2889_v53, %v2923_v27 }
0x147a   :  { %v2260_v14 = vpop.eup %2259  ;;  %v1410_v11 = vmul.f32 1.442695, %v1399_v12 }
0x147b   :  { %1432 = vrot.lane.b32.xlu2 %v2260_v14, %s2360_s16  ;;  %v2262_v31 = vpop.eup %2261  ;;  %v1366_v14 = vmin.f32 %v1358_v8, 3.0 }
0x147c   :  { %2263 = vpow2.f32 %v1410_v11  ;;  %v2939_v2 = vmul.f32 0.6931472, %v2262_v31  ;;  %v1360_v31 = vmax.f32 %v2899_v61, -5.0 }
0x147d   :  { %2265 = vlog2.f32 %v1512_v25 }
0x147e   :  { %2267 = vlog2.f32 %v1509_v30  ;;  %v2052_v38 = vadd.f32 -0.3, %v2939_v2  ;;  %v1551_v30 = vsub.f32 0.0, %v1366_v14  ;;  %v1368_v43 = vmin.f32 %v1360_v31, 3.0 }
0x147f   :  { %v2937_v32 = vpop.xlane.xlu2 %1385 }
0x1480   :  { %v1400_v34 = vsub.f32 %v2894_v57, %v2937_v32  ;;  %v1542_v41 = vmul.f32 0.5882353, %v2052_v38 }
0x1482   :  { %v2264_v36 = vpop.eup %2263  ;;  %v1412_v55 = vmul.f32 1.442695, %v1400_v34 }
0x1483   :  { %1574 = vperm.xlu2 %2090, %v1540_v33   ;;  %1434 = vrot.lane.b32.xlu0 %v2264_v36, %s2360_s16  ;;  %v2266_v59 = vpop.eup %2265  ;;  %v1356_v36 = vmax.f32 %v2878_v39, -5.0 }
0x1484   :  { %2269 = vpow2.f32 %v1412_v55  ;;  %v2268_v18 = vpop.eup %2267  ;;  %v2954_v46 = vmul.f32 0.6931472, %v2266_v59  ;;  %v1562_v55 = vmul.f32 1.442695, %v1551_v30  ;;  %v1553_v59 = vsub.f32 0.0, %v1368_v43 }
0x1485   :  { %2271 = vlog2.f32 %v1514_v37  ;;  %v2960_v26 = vmul.f32 0.6931472, %v2268_v18  ;;  %v1364_v29 = vmin.f32 %v1356_v36, 3.0 }
0x1486   :  { %2273 = vlog2.f32 %v1511_v24  ;;  %v2054_v52 = vadd.f32 -0.3, %v2954_v46 }
0x1487   :  { %v2952_v7 = vpop.xlane.xlu0 %1388  ;;  %v2051_v62 = vadd.f32 -0.3, %v2960_v26  ;;  %v1549_v18 = vsub.f32 0.0, %v1364_v29 }
0x1488   :  { %v1401_v45 = vsub.f32 %v2899_v61, %v2952_v7  ;;  %v1544_v35 = vmul.f32 0.5882353, %v2054_v52 }
0x1489   :  { %v1541_v3 = vmul.f32 0.5882353, %v2051_v62 }
0x148a   :  { %v2270_v47 = vpop.eup %2269  ;;  %v1414_v48 = vmul.f32 1.442695, %v1401_v45 }
0x148b   :  { %1584 = vperm.xlu2 %2090, %v1542_v41   ;;  %1436 = vrot.lane.b32.xlu1 %v2270_v47, %s2360_s16  ;;  %v2272_v58 = vpop.eup %2271  ;;  %v1359_v41 = vmax.f32 %v2894_v57, -5.0  ;;  %v1566_v47 = vmul.f32 1.442695, %v1553_v59 }
0x148c   :  { %2275 = vpow2.f32 %v1414_v48  ;;  %v2274_v22 = vpop.eup %2273  ;;  %v2972_v17 = vmul.f32 0.6931472, %v2272_v58  ;;  %v1558_v48 = vmul.f32 1.442695, %v1549_v18 }
0x148d   :  { %2277 = vlog2.f32 %v1513_v56  ;;  %v2974_v0 = vmul.f32 0.6931472, %v2274_v22  ;;  %v1367_v51 = vmin.f32 %v1359_v41, 3.0 }
0x148e   :  { %v2056_v15 = vadd.f32 -0.3, %v2972_v17  ;;  %2279 = vpow2.f32 %v1560_v4 }
0x148f   :  { %v2053_v21 = vadd.f32 -0.3, %v2974_v0  ;;  %2281 = vlog2.f32 %v1515_v19  ;;  %v1552_v54 = vsub.f32 0.0, %v1367_v51 }
0x1490   :  { %v1546_v11 = vmul.f32 0.5882353, %v2056_v15  ;;  %2283 = vpow2.f32 %v1556_v10 }
0x1491   :  { %v1543_v9 = vmul.f32 0.5882353, %v2053_v21  ;;  %2285 = vpow2.f32 %v1562_v55  ;;  %v1564_v56 = vmul.f32 1.442695, %v1552_v54 }
0x1492   :  { %v2276_v6 = vpop.eup %2275  ;;  %2287 = vpow2.f32 %v1566_v47 }
0x1493   :  { %1594 = vperm.xlu2 %2090, %v1544_v35   ;;  %1438 = vrot.lane.b32.xlu0 %v2276_v6, %s2360_s16  ;;  %v2278_v12 = vpop.eup %2277  ;;  %2289 = vpow2.f32 %v1558_v48 }
0x1494   :  { %1579 = vperm.xlu1 %2091, %v1541_v3   ;;  %v2984_v25 = vmul.f32 0.6931472, %v2278_v12  ;;  %v2280_v49 = vpop.eup %2279  ;;  %2291 = vpow2.f32 %v1564_v56  ;;  %v3016_v12 = vadd.f32 %v1350_v13, %v2865_v28 }
0x1495   :  { %v2282_v34 = vpop.eup %2281 }
0x1496   :  { %v2055_v33 = vadd.f32 -0.3, %v2984_v25  ;;  %v2990_v38 = vmul.f32 0.6931472, %v2282_v34  ;;  %v2284_v24 = vpop.eup %2283 }
0x1497   :  { %v2286_v52 = vpop.eup %2285 }
0x1498   :  { %v1545_v37 = vmul.f32 0.5882353, %v2055_v33  ;;  %v2057_v40 = vadd.f32 -0.3, %v2990_v38  ;;  %v2288_v58 = vpop.eup %2287 }
0x1499   :  { %v2290_v60 = vpop.eup %2289 }
0x149a   :  { %v1547_v45 = vmul.f32 0.5882353, %v2057_v40  ;;  %v2292_v62 = vpop.eup %2291 }
0x149b   :  { %1604 = vperm.xlu2 %2090, %v1546_v11   ;;  %1632 = vrot.lane.b32.xlu0 %v2280_v49, %s2364_s14  ;;  %v1352_v49 = vpop.f32.mrf.mxu0 }
0x149c   :  { %1589 = vperm.xlu1 %2091, %v1543_v9   ;;  %v1390_v9 = vsel %vm1371_vm12, %v3016_v12, -inf  ;;  %v3023_v33 = vadd.f32 %v1352_v49, %v2865_v28 }
0x149e   :  { %v1362_v55 = vmax.f32 %v3023_v33, -5.0 }
0x14a3   :  { %1686 = vrot.lane.b32.xlu0 %v1364_v29, %s2364_s14  ;;  %1628 = vrot.lane.b32.xlu2 %v2284_v24, %s2364_s14  ;;  %v1361_v29 = vmax.f32 %v3016_v12, -5.0  ;;  %v1370_v24 = vmin.f32 %v1362_v55, 3.0 }
0x14a4   :  { %1599 = vperm.xlu1 %2091, %v1545_v37   ;;  %v1393_v37 = vsel %vm1371_vm12, %v3023_v33, -inf }
0x14a5   :  { %v1369_v59 = vmin.f32 %v1361_v29, 3.0  ;;  %v1555_v48 = vsub.f32 0.0, %v1370_v24 }
0x14a7   :  { %v1554_v47 = vsub.f32 0.0, %v1369_v59 }
0x14ab   :  { %1692 = vrot.lane.b32.xlu0 %v1367_v51, %s2364_s14  ;;  %1634 = vrot.lane.b32.xlu2 %v2286_v52, %s2364_s14  ;;  %v1568_v51 = vmul.f32 1.442695, %v1554_v47  ;;  %v1570_v52 = vmul.f32 1.442695, %v1555_v48 }
0x14ac   :  { %1609 = vperm.xlu1 %2091, %v1547_v45  }
0x14ad   :  { %2293 = vpow2.f32 %v1568_v51 }
0x14ae   :  { %2295 = vpow2.f32 %v1570_v52 }
0x14b3   :  { %1638 = vrot.lane.b32.xlu2 %v2288_v58, %s2364_s14 }
0x14b4   :  { %1630 = vrot.lane.b32.xlu1 %v2290_v60, %s2364_s14 }
0x14bb   :  { %1688 = vrot.lane.b32.xlu2 %v2956_v42, %s2364_s14 }
0x14bc   :  { %1636 = vrot.lane.b32.xlu1 %v2292_v62, %s2364_s14 }
0x14c3   :  { %1694 = vrot.lane.b32.xlu2 %v1368_v43, %s2364_s14 }
0x14c4   :  { %1684 = vrot.lane.b32.xlu1 %v2970_v1, %s2364_s14 }
0x14cc   :  { %1690 = vrot.lane.b32.xlu1 %v1366_v14, %s2364_s14 }
0x14d5   :  { %v1433_v22 = vpop.permute.xlu2 %1432 }
0x14d6   :  { %v1429_v35 = vpop.permute.xlu0 %1428  ;;  %v1458_v1 = vsel %vm53_vm2, %v1433_v22, 0.0  ;;  %v2294_v22 = vpop.eup %2293 }
0x14d7   :  { %v1452_v3 = vsel %vm53_vm2, %v1429_v35, 0.0 }
0x14d8   :  { %1453 = vadd.xlane.f32.xlu0 %v1452_v3 }
0x14dd   :  { %v1575_v4 = vpop.permute.xlu2 %1574 }
0x14de   :  { %v1431_v8 = vpop.permute.xlu1 %1430  ;;  %v1612_v14 = vsub.f32 %v1575_v4, %v2869_v44  ;;  %v2296_v4 = vpop.eup %2295 }
0x14df   :  { %v1455_v15 = vsel %vm53_vm2, %v1431_v8, 0.0 }
0x14e5   :  { %v1585_v6 = vpop.permute.xlu2 %1584 }
0x14e6   :  { %v1614_v40 = vsub.f32 %v1585_v6, %v2884_v50 }
0x14ec   :  { %1456 = vadd.xlane.f32.xlu2 %v1455_v15 }
0x14ed   :  { %v3009_v42 = vpop.permute.xlu2 %1594 }
0x14f5   :  { %v1435_v19 = vpop.permute.xlu0 %1434  ;;  %v3011_v20 = vpop.permute.xlu2 %1604 }
0x14f6   :  { %1459 = vadd.xlane.f32.xlu1 %v1458_v1  ;;  %v1461_v21 = vsel %vm53_vm2, %v1435_v19, 0.0 }
0x14f7   :  { %1462 = vadd.xlane.f32.xlu0 %v1461_v21 }
0x14fd   :  { %v1437_v11 = vpop.permute.xlu1 %1436  ;;  %v1629_v10 = vpop.permute.xlu2 %1628 }
0x14fe   :  { %1391 = vmax.xlane.f32.xlu1 %v1390_v9  ;;  %v1652_v30 = vmul.f32 %v1629_v10, %v1612_v14  ;;  %v1464_v31 = vsel %vm53_vm2, %v1437_v11, 0.0  ;;  %v1616_v11 = vsub.f32 %v3009_v42, %v2894_v57 }
0x14ff   :  { %1465 = vadd.xlane.f32.xlu2 %v1464_v31 }
0x1500   :  { %v1660_v55 = vmul.f32 %v1652_v30, %v1652_v30 }
0x1502   :  { %v1668_v29 = vmul.f32 -0.5, %v1660_v55 }
0x1505   :  { %v3025_v34 = vpop.permute.xlu0 %1438  ;;  %v1635_v36 = vpop.permute.xlu2 %1634 }
0x1506   :  { %v1580_v43 = vpop.permute.xlu1 %1579 }
0x1507   :  { %1394 = vmax.xlane.f32.xlu2 %v1393_v37  ;;  %v1613_v15 = vsub.f32 %v1580_v43, %v2878_v39 }
0x150b   :  { %1698 = vrot.lane.b32.xlu0 %v1370_v24, %s2364_s14 }
0x150d   :  { %v1633_v28 = vpop.permute.xlu0 %1632  ;;  %v1639_v18 = vpop.permute.xlu2 %1638 }
0x150e   :  { %v1654_v41 = vmul.f32 %v1633_v28, %v1614_v40  ;;  %v1590_v45 = vpop.permute.xlu1 %1589 }
0x150f   :  { %v1615_v37 = vsub.f32 %v1590_v45, %v2889_v53 }
0x1511   :  { %v1655_v24 = vmul.f32 %v1635_v36, %v1615_v37 }
0x1513   :  { %v1663_v40 = vmul.f32 %v1655_v24, %v1655_v24 }
0x1515   :  { %v1689_v54 = vpop.permute.xlu2 %1688  ;;  %v1687_v14 = vpop.permute.xlu0 %1686  ;;  %v1671_v28 = vmul.f32 -0.5, %v1663_v40 }
0x1516   :  { %v1600_v56 = vpop.permute.xlu1 %1599 }
0x1517   :  { %v1617_v58 = vsub.f32 %v1600_v56, %v2899_v61  ;;  %1696 = vrot.lane.b32.xlu1 %v1369_v59, %s2364_s14  ;;  %v1662_v56 = vmul.f32 %v1654_v41, %v1654_v41  ;;  %v1467_v41 = vsel %vm53_vm2, %v3025_v34, 0.0 }
0x1519   :  { %v1657_v60 = vmul.f32 %v1639_v18, %v1617_v58 }
0x151b   :  { %v1665_v62 = vmul.f32 %v1657_v60, %v1657_v60 }
0x151d   :  { %v3035_v35 = vmul.f32 -0.5, %v1665_v62  ;;  %v3037_v3 = vpop.permute.xlu2 %1694 }
0x151e   :  { %v1610_v6 = vpop.permute.xlu1 %1609 }
0x151f   :  { %v1713_v8 = vsub.f32 %v3035_v35, %v3037_v3  ;;  %1640 = vrot.lane.b32.xlu1 %v2294_v22, %s2364_s14  ;;  %1642 = vrot.lane.b32.xlu2 %v2296_v4, %s2364_s14  ;;  %v1670_v22 = vmul.f32 -0.5, %v1662_v56 }
0x1526   :  { %v1631_v13 = vpop.permute.xlu1 %1630 }
0x1527   :  { %v1653_v19 = vmul.f32 %v1631_v13, %v1613_v15  ;;  %v1710_v15 = vsub.f32 %v1670_v22, %v1689_v54 }
0x1529   :  { %v1661_v1 = vmul.f32 %v1653_v19, %v1653_v19  ;;  %v2060_v13 = vadd.f32 -0.9189385, %v1710_v15 }
0x152b   :  { %v1669_v21 = vmul.f32 -0.5, %v1661_v1  ;;  %v1693_v1 = vpop.permute.xlu0 %1692 }
0x152d   :  { %v1709_v9 = vsub.f32 %v1669_v21, %v1687_v14 }
0x152e   :  { %v1637_v10 = vpop.permute.xlu1 %1636 }
0x152f   :  { %v1656_v49 = vmul.f32 %v1637_v10, %v1616_v11  ;;  %v2059_v31 = vadd.f32 -0.9189385, %v1709_v9  ;;  %v1619_v9 = vsub.f32 %v1610_v6, %v3023_v33 }
0x1531   :  { %1734 = vrot.lane.b32.xlu0 %v2059_v31, %s2362_s28  ;;  %v1664_v14 = vmul.f32 %v1656_v49, %v1656_v49 }
0x1533   :  { %v1672_v10 = vmul.f32 -0.5, %v1664_v14 }
0x1535   :  { %v1712_v37 = vsub.f32 %v1672_v10, %v1693_v1 }
0x1536   :  { %v1685_v43 = vpop.permute.xlu1 %1684 }
0x1537   :  { %v1708_v59 = vsub.f32 %v1668_v29, %v1685_v43  ;;  %v2062_v43 = vadd.f32 -0.9189385, %v1712_v37 }
0x1539   :  { %v2058_v31 = vadd.f32 -0.9189385, %v1708_v59  ;;  %v2063_v59 = vadd.f32 -0.9189385, %v1713_v8 }
0x153e   :  { %v1691_v18 = vpop.permute.xlu1 %1690 }
0x153f   :  { %v1711_v47 = vsub.f32 %v1671_v28, %v1691_v18 }
0x1541   :  { %v2061_v48 = vadd.f32 -0.9189385, %v1711_v47 }
0x1543   :  { %1738 = vrot.lane.b32.xlu0 %v2061_v48, %s2362_s28 }
0x154b   :  { %v1454_v21 = vpop.xlane.xlu0 %1453 }
0x155f   :  { %v3049_v51 = vpop.xlane.xlu2 %1456 }
0x1569   :  { %v1460_v42 = vpop.xlane.xlu1 %1459 }
0x156a   :  { %v1463_v55 = vpop.xlane.xlu0 %1462 }
0x1571   :  { %v3051_v52 = vpop.xlane.xlu1 %1391 }
0x1572   :  { %v1402_v30 = vsub.f32 %v3016_v12, %v3051_v52  ;;  %v3055_v45 = vpop.xlane.xlu2 %1465 }
0x1574   :  { %v1416_v36 = vmul.f32 1.442695, %v1402_v30 }
0x1576   :  { %2297 = vpow2.f32 %v1416_v36 }
0x157a   :  { %v3057_v58 = vpop.xlane.xlu2 %1394 }
0x157b   :  { %v1403_v60 = vsub.f32 %v3023_v33, %v3057_v58 }
0x157c   :  { %v2298_v62 = vpop.eup %2297 }
0x157d   :  { %v1418_v4 = vmul.f32 1.442695, %v1403_v60  ;;  %1440 = vrot.lane.b32.xlu2 %v2298_v62, %s2360_s16  ;;  %v1699_v34 = vpop.permute.xlu0 %1698 }
0x157f   :  { %2299 = vpow2.f32 %v1418_v4  ;;  %v1618_v4 = vsub.f32 %v3011_v20, %v3016_v12 }
0x1580   :  { %2301 = vlog2.f32 %v1460_v42 }
0x1581   :  { %2303 = vlog2.f32 %v3049_v51 }
0x1582   :  { %v1643_v11 = vpop.permute.xlu2 %1642  ;;  %2305 = vlog2.f32 %v1454_v21 }
0x1583   :  { %v1659_v54 = vmul.f32 %v1643_v11, %v1619_v9  ;;  %2307 = vlog2.f32 %v1463_v55 }
0x1584   :  { %2309 = vlog2.f32 %v3055_v45 }
0x1585   :  { %v2300_v19 = vpop.eup %2299  ;;  %1736 = vrot.lane.b32.xlu2 %v2060_v13, %s2362_s28  ;;  %v1667_v29 = vmul.f32 %v1659_v54, %v1659_v54 }
0x1586   :  { %1442 = vrot.lane.b32.xlu1 %v2300_v19, %s2360_s16  ;;  %v2302_v48 = vpop.eup %2301 }
0x1587   :  { %v1675_v24 = vmul.f32 -0.5, %v1667_v29  ;;  %v1481_v30 = vmul.f32 0.6931472, %v2302_v48  ;;  %v2304_v19 = vpop.eup %2303 }
0x1588   :  { %v2306_v20 = vpop.eup %2305 }
0x1589   :  { %v1715_v40 = vsub.f32 %v1675_v24, %v1699_v34  ;;  %v1697_v6 = vpop.permute.xlu1 %1696  ;;  %v1494_v36 = vadd.f32 %v1481_v30, %v2916_v16  ;;  %v2308_v1 = vpop.eup %2307  ;;  %v1477_v14 = vmul.f32 0.6931472, %v2306_v20 }
0x158a   :  { %v1483_v10 = vmul.f32 0.6931472, %v2308_v1  ;;  %v2310_v51 = vpop.eup %2309 }
0x158b   :  { %v2065_v18 = vadd.f32 -0.9189385, %v1715_v40  ;;  %v1502_v22 = vsub.f32 %v2884_v50, %v1494_v36  ;;  %v1479_v50 = vmul.f32 0.6931472, %v2304_v19  ;;  %v1492_v54 = vadd.f32 %v1477_v14, %v2903_v63 }
0x158c   :  { %v1495_v21 = vadd.f32 %v1483_v10, %v2923_v27  ;;  %v1485_v55 = vmul.f32 0.6931472, %v2310_v51 }
0x158e   :  { %v1496_v40 = vadd.f32 %v1485_v55, %v2937_v32 }
0x1590   :  { %v1504_v27 = vsub.f32 %v2894_v57, %v1496_v40 }
0x1591   :  { %v1641_v47 = vpop.permute.xlu1 %1640 }
0x1592   :  { %v1658_v3 = vmul.f32 %v1641_v47, %v1618_v4 }
0x1594   :  { %v1666_v42 = vmul.f32 %v1658_v3, %v1658_v3 }
0x1596   :  { %v1674_v15 = vmul.f32 -0.5, %v1666_v42 }
0x1598   :  { %v1714_v16 = vsub.f32 %v1674_v15, %v1697_v6 }
0x159a   :  { %v2064_v13 = vadd.f32 -0.9189385, %v1714_v16 }
0x15a3   :  { %v1735_v11 = vpop.permute.xlu0 %1734 }
0x15b0   :  { %1468 = vadd.xlane.f32.xlu1 %v1467_v41  ;;  %v1493_v41 = vadd.f32 %v1479_v50, %v2907_v23  ;;  %v1500_v23 = vsub.f32 %v2869_v44, %v1492_v54 }
0x15b5   :  { %v1739_v24 = vpop.permute.xlu0 %1738 }
0x15c9   :  { %1732 = vrot.lane.b32.xlu1 %v2058_v31, %s2362_s28  ;;  %v1501_v31 = vsub.f32 %v2878_v39, %v1493_v41 }
0x15cb   :  { %v1757_v37 = vadd.f32 %v1735_v11, %v1501_v31 }
0x15cd   :  { %v1767_v29 = vsel %vm1371_vm12, %v1757_v37, -inf }
0x15d1   :  { %1740 = vrot.lane.b32.xlu1 %v2062_v43, %s2362_s28  ;;  %v1503_v43 = vsub.f32 %v2889_v53, %v1495_v21 }
0x15d3   :  { %v1759_v39 = vadd.f32 %v1739_v24, %v1503_v43 }
0x15d7   :  { %v1441_v28 = vpop.permute.xlu2 %1440 }
0x15d8   :  { %v1470_v49 = vsel %vm53_vm2, %v1441_v28, 0.0  ;;  %v1773_v28 = vsel %vm1371_vm12, %v1759_v39, -inf }
0x15d9   :  { %1471 = vadd.xlane.f32.xlu0 %v1470_v49  ;;  %1746 = vrot.lane.b32.xlu1 %v2065_v18, %s2362_s28 }
0x15df   :  { %v1737_v62 = vpop.permute.xlu2 %1736 }
0x15e0   :  { %v3080_v35 = vadd.f32 %v1737_v62, %v1502_v22 }
0x15e2   :  { %v1770_v8 = vsel %vm1371_vm12, %v3080_v35, -inf }
0x15ed   :  { %1742 = vrot.lane.b32.xlu0 %v2063_v59, %s2362_s28 }
0x15f8   :  { %v1443_v56 = vpop.permute.xlu1 %1442 }
0x15f9   :  { %v1473_v60 = vsel %vm53_vm2, %v1443_v56, 0.0 }
0x15fa   :  { %1474 = vadd.xlane.f32.xlu2 %v1473_v60 }
0x1603   :  { %1771 = vmax.xlane.f32.xlu1 %v1770_v8 }
0x1612   :  { %1744 = vrot.lane.b32.xlu2 %v2064_v13, %s2362_s28 }
0x1623   :  { %v1469_v9 = vpop.xlane.xlu1 %1468 }
0x1624   :  { %2311 = vlog2.f32 %v1469_v9 }
0x162a   :  { %v2312_v6 = vpop.eup %2311 }
0x162b   :  { %v1487_v53 = vmul.f32 0.6931472, %v2312_v6 }
0x162d   :  { %v1497_v32 = vadd.f32 %v1487_v53, %v2952_v7 }
0x162f   :  { %v1505_v47 = vsub.f32 %v2899_v61, %v1497_v32 }
0x163b   :  { %1768 = vmax.xlane.f32.xlu2 %v1767_v29  ;;  %v1733_v45 = vpop.permute.xlu1 %1732 }
0x163c   :  { %v1756_v34 = vadd.f32 %v1733_v45, %v1500_v23 }
0x163e   :  { %v1764_v63 = vsel %vm1371_vm12, %v1756_v34, -inf }
0x163f   :  { %1765 = vmax.xlane.f32.xlu0 %v1764_v63 }
0x1643   :  { %1774 = vmax.xlane.f32.xlu2 %v1773_v28  ;;  %v1741_v18 = vpop.permute.xlu1 %1740 }
0x1644   :  { %v1760_v49 = vadd.f32 %v1741_v18, %v1504_v27 }
0x1646   :  { %v1776_v44 = vsel %vm1371_vm12, %v1760_v49, -inf }
0x1647   :  { %1777 = vmax.xlane.f32.xlu0 %v1776_v44 }
0x164b   :  { %v1747_v42 = vpop.permute.xlu1 %1746 }
0x164c   :  { %v1472_v59 = vpop.xlane.xlu0 %1471 }
0x164d   :  { %2313 = vlog2.f32 %v1472_v59 }
0x1653   :  { %v2314_v57 = vpop.eup %2313 }
0x1654   :  { %v1489_v56 = vmul.f32 0.6931472, %v2314_v57 }
0x1656   :  { %v1498_v62 = vadd.f32 %v1489_v56, %v3051_v52 }
0x1658   :  { %v1506_v4 = vsub.f32 %v3016_v12, %v1498_v62 }
0x165f   :  { %v1743_v48 = vpop.permute.xlu0 %1742 }
0x1660   :  { %v1761_v30 = vadd.f32 %v1743_v48, %v1505_v47 }
0x1662   :  { %v1779_v36 = vsel %vm1371_vm12, %v1761_v30, -inf }
0x1663   :  { %1780 = vmax.xlane.f32.xlu1 %v1779_v36 }
0x166d   :  { %v1475_v60 = vpop.xlane.xlu2 %1474 }
0x166e   :  { %2315 = vlog2.f32 %v1475_v60 }
0x1674   :  { %v2316_v22 = vpop.eup %2315 }
0x1675   :  { %v1491_v3 = vmul.f32 0.6931472, %v2316_v22  ;;  %v1745_v8 = vpop.permute.xlu2 %1744 }
0x1676   :  { %v1762_v7 = vadd.f32 %v1745_v8, %v1506_v4  ;;  %v3108_v50 = vpop.xlane.xlu1 %1771 }
0x1677   :  { %v1499_v61 = vadd.f32 %v1491_v3, %v3057_v58  ;;  %v1790_v12 = vsub.f32 %v3080_v35, %v3108_v50 }
0x1678   :  { %v1782_v15 = vsel %vm1371_vm12, %v1762_v7, -inf }
0x1679   :  { %1783 = vmax.xlane.f32.xlu2 %v1782_v15  ;;  %v1507_v16 = vsub.f32 %v3023_v33, %v1499_v61  ;;  %v1800_v52 = vmul.f32 1.442695, %v1790_v12 }
0x167b   :  { %v1763_v13 = vadd.f32 %v1747_v42, %v1507_v16  ;;  %2317 = vpow2.f32 %v1800_v52 }
0x167d   :  { %v1785_v19 = vsel %vm1371_vm12, %v1763_v13, -inf }
0x167e   :  { %1786 = vmax.xlane.f32.xlu0 %v1785_v19 }
0x1681   :  { %v2318_v20 = vpop.eup %2317 }
0x1692   :  { %1824 = vrot.lane.b32.xlu0 %v2318_v20, %s2360_s16 }
0x16ae   :  { %v3113_v58 = vpop.xlane.xlu2 %1768 }
0x16af   :  { %v1789_v41 = vsub.f32 %v1757_v37, %v3113_v58 }
0x16b1   :  { %v1798_v1 = vmul.f32 1.442695, %v1789_v41 }
0x16b2   :  { %v3116_v33 = vpop.xlane.xlu0 %1765 }
0x16b3   :  { %2319 = vpow2.f32 %v1798_v1  ;;  %v1788_v14 = vsub.f32 %v1756_v34, %v3116_v33 }
0x16b5   :  { %v1796_v11 = vmul.f32 1.442695, %v1788_v14 }
0x16b6   :  { %v3119_v9 = vpop.xlane.xlu2 %1774 }
0x16b7   :  { %2321 = vpow2.f32 %v1796_v11  ;;  %v1791_v35 = vsub.f32 %v1759_v39, %v3119_v9 }
0x16b9   :  { %v2320_v10 = vpop.eup %2319  ;;  %v1802_v31 = vmul.f32 1.442695, %v1791_v35 }
0x16ba   :  { %v3122_v54 = vpop.xlane.xlu0 %1777  ;;  %1822 = vrot.lane.b32.xlu2 %v2320_v10, %s2360_s16 }
0x16bb   :  { %2323 = vpow2.f32 %v1802_v31  ;;  %v1792_v37 = vsub.f32 %v1760_v49, %v3122_v54 }
0x16bd   :  { %v2322_v51 = vpop.eup %2321  ;;  %v1804_v21 = vmul.f32 1.442695, %v1792_v37 }
0x16be   :  { %1820 = vrot.lane.b32.xlu1 %v2322_v51, %s2360_s16 }
0x16bf   :  { %2325 = vpow2.f32 %v1804_v21 }
0x16c1   :  { %v2324_v55 = vpop.eup %2323 }
0x16c2   :  { %1826 = vrot.lane.b32.xlu0 %v2324_v55, %s2360_s16 }
0x16c5   :  { %v2326_v29 = vpop.eup %2325 }
0x16c6   :  { %1828 = vrot.lane.b32.xlu1 %v2326_v29, %s2360_s16 }
0x16d6   :  { %v3129_v23 = vpop.xlane.xlu1 %1780 }
0x16d7   :  { %v1793_v24 = vsub.f32 %v1761_v30, %v3129_v23 }
0x16d9   :  { %v1806_v45 = vmul.f32 1.442695, %v1793_v24 }
0x16db   :  { %2327 = vpow2.f32 %v1806_v45 }
0x16e1   :  { %v2328_v43 = vpop.eup %2327 }
0x16e2   :  { %1830 = vrot.lane.b32.xlu2 %v2328_v43, %s2360_s16 }
0x16ec   :  { %v3133_v34 = vpop.xlane.xlu2 %1783 }
0x16ed   :  { %v1794_v40 = vsub.f32 %v1762_v7, %v3133_v34 }
0x16ef   :  { %v1808_v39 = vmul.f32 1.442695, %v1794_v40 }
0x16f1   :  { %2329 = vpow2.f32 %v1808_v39  ;;  %v3136_v63 = vpop.xlane.xlu0 %1786 }
0x16f2   :  { %v1795_v28 = vsub.f32 %v1763_v13, %v3136_v63 }
0x16f4   :  { %v1810_v27 = vmul.f32 1.442695, %v1795_v28 }
0x16f6   :  { %2331 = vpow2.f32 %v1810_v27 }
0x16f7   :  { %v2330_v18 = vpop.eup %2329 }
0x16f8   :  { %1832 = vrot.lane.b32.xlu0 %v2330_v18, %s2360_s16 }
0x16fc   :  { %v2332_v49 = vpop.eup %2331 }
0x16fd   :  { %1834 = vrot.lane.b32.xlu1 %v2332_v49, %s2360_s16 }
0x1704   :  { %v1825_v53 = vpop.permute.xlu0 %1824 }
0x1705   :  { %v1850_v59 = vsel %vm53_vm2, %v1825_v53, 0.0 }
0x1714   :  { %v1823_v44 = vpop.permute.xlu2 %1822 }
0x1715   :  { %v1847_v6 = vsel %vm53_vm2, %v1823_v44, 0.0 }
0x1722   :  { %1848 = vadd.xlane.f32.xlu0 %v1847_v6 }
0x1727   :  { %1851 = vadd.xlane.f32.xlu1 %v1850_v59 }
0x1730   :  { %v1821_v32 = vpop.permute.xlu1 %1820 }
0x1731   :  { %v1844_v47 = vsel %vm53_vm2, %v1821_v32, 0.0 }
0x1732   :  { %1845 = vadd.xlane.f32.xlu2 %v1844_v47 }
0x1734   :  { %v1827_v48 = vpop.permute.xlu0 %1826 }
0x1735   :  { %v1853_v36 = vsel %vm53_vm2, %v1827_v48, 0.0 }
0x1738   :  { %v1829_v30 = vpop.permute.xlu1 %1828 }
0x1739   :  { %v1856_v57 = vsel %vm53_vm2, %v1829_v30, 0.0 }
0x173a   :  { %1854 = vadd.xlane.f32.xlu2 %v1853_v36  ;;  %1857 = vadd.xlane.f32.xlu0 %v1856_v57 }
0x173c   :  { %v1831_v56 = vpop.permute.xlu2 %1830 }
0x173d   :  { %v1859_v60 = vsel %vm53_vm2, %v1831_v56, 0.0 }
0x173e   :  { %1860 = vadd.xlane.f32.xlu1 %v1859_v60 }
0x176a   :  { %v1833_v62 = vpop.permute.xlu0 %1832 }
0x176b   :  { %v1862_v22 = vsel %vm53_vm2, %v1833_v62, 0.0 }
0x176c   :  { %1863 = vadd.xlane.f32.xlu2 %v1862_v22 }
0x176f   :  { %v1835_v4 = vpop.permute.xlu1 %1834 }
0x1770   :  { %v1865_v3 = vsel %vm53_vm2, %v1835_v4, 0.0 }
0x1771   :  { %1866 = vadd.xlane.f32.xlu0 %v1865_v3 }
0x1795   :  { %v1849_v8 = vpop.xlane.xlu0 %1848 }
0x1796   :  { %2333 = vlog2.f32 %v1849_v8 }
0x179a   :  { %v1852_v7 = vpop.xlane.xlu1 %1851 }
0x179b   :  { %2335 = vlog2.f32 %v1852_v7 }
0x179c   :  { %v2334_v61 = vpop.eup %2333 }
0x179d   :  { %v1871_v42 = vmul.f32 0.6931472, %v2334_v61 }
0x179f   :  { %v1885_v15 = vadd.f32 %v1871_v42, %v3113_v58 }
0x17a1   :  { %v2336_v16 = vpop.eup %2335  ;;  %v1893_v13 = vsub.f32 %v1885_v15, %v2960_v26 }
0x17a2   :  { %v1873_v19 = vmul.f32 0.6931472, %v2336_v16 }
0x17a3   :  { %v2067_v12 = vadd.f32 -0.53062826, %v1893_v13 }
0x17a4   :  { %v1886_v52 = vadd.f32 %v1873_v19, %v3108_v50 }
0x17a5   :  { %1926 = vrot.lane.b32.xlu2 %v2067_v12, %s2364_s14  ;;  %v1846_v20 = vpop.xlane.xlu2 %1845 }
0x17a6   :  { %2337 = vlog2.f32 %v1846_v20  ;;  %v1894_v41 = vsub.f32 %v1886_v52, %v2939_v2 }
0x17a8   :  { %v2068_v1 = vadd.f32 -0.53062826, %v1894_v41 }
0x17aa   :  { %1928 = vrot.lane.b32.xlu0 %v2068_v1, %s2364_s14 }
0x17ac   :  { %v2338_v14 = vpop.eup %2337 }
0x17ad   :  { %v1869_v11 = vmul.f32 0.6931472, %v2338_v14  ;;  %v1858_v35 = vpop.xlane.xlu0 %1857  ;;  %v1855_v58 = vpop.xlane.xlu2 %1854 }
0x17ae   :  { %2339 = vlog2.f32 %v1858_v35 }
0x17af   :  { %v1884_v26 = vadd.f32 %v1869_v11, %v3116_v33  ;;  %2341 = vlog2.f32 %v1855_v58 }
0x17b1   :  { %v1861_v10 = vpop.xlane.xlu1 %1860  ;;  %v1892_v50 = vsub.f32 %v1884_v26, %v2925_v5 }
0x17b2   :  { %2343 = vlog2.f32 %v1861_v10 }
0x17b3   :  { %v2066_v31 = vadd.f32 -0.53062826, %v1892_v50 }
0x17b4   :  { %v2340_v37 = vpop.eup %2339 }
0x17b5   :  { %v2342_v51 = vpop.eup %2341  ;;  %v1877_v21 = vmul.f32 0.6931472, %v2340_v37  ;;  %1924 = vrot.lane.b32.xlu1 %v2066_v31, %s2364_s14 }
0x17b6   :  { %v1875_v2 = vmul.f32 0.6931472, %v2342_v51 }
0x17b7   :  { %v1888_v55 = vadd.f32 %v1877_v21, %v3122_v54 }
0x17b8   :  { %v2344_v29 = vpop.eup %2343  ;;  %v1887_v24 = vadd.f32 %v1875_v2, %v3119_v9 }
0x17b9   :  { %v1879_v45 = vmul.f32 0.6931472, %v2344_v29  ;;  %v1896_v33 = vsub.f32 %v1888_v55, %v2954_v46 }
0x17ba   :  { %v1895_v43 = vsub.f32 %v1887_v24, %v2974_v0 }
0x17bb   :  { %v1889_v5 = vadd.f32 %v1879_v45, %v3129_v23  ;;  %v2070_v40 = vadd.f32 -0.53062826, %v1896_v33 }
0x17bc   :  { %v2069_v39 = vadd.f32 -0.53062826, %v1895_v43 }
0x17bd   :  { %1932 = vrot.lane.b32.xlu2 %v2070_v40, %s2364_s14  ;;  %v1897_v28 = vsub.f32 %v1889_v5, %v2984_v25 }
0x17be   :  { %1930 = vrot.lane.b32.xlu1 %v2069_v39, %s2364_s14 }
0x17bf   :  { %v2071_v27 = vadd.f32 -0.53062826, %v1897_v28 }
0x17c1   :  { %1934 = vrot.lane.b32.xlu0 %v2071_v27, %s2364_s14 }
0x17df   :  { %v1864_v54 = vpop.xlane.xlu2 %1863 }
0x17e0   :  { %2345 = vlog2.f32 %v1864_v54 }
0x17e4   :  { %v1867_v9 = vpop.xlane.xlu0 %1866 }
0x17e5   :  { %2347 = vlog2.f32 %v1867_v9 }
0x17e6   :  { %v2346_v46 = vpop.eup %2345 }
0x17e7   :  { %v1881_v18 = vmul.f32 0.6931472, %v2346_v46 }
0x17e9   :  { %v1890_v0 = vadd.f32 %v1881_v18, %v3133_v34 }
0x17eb   :  { %v2348_v23 = vpop.eup %2347  ;;  %v1898_v49 = vsub.f32 %v1890_v0, %v2972_v17 }
0x17ec   :  { %v1883_v44 = vmul.f32 0.6931472, %v2348_v23 }
0x17ed   :  { %v2072_v6 = vadd.f32 -0.53062826, %v1898_v49 }
0x17ee   :  { %v1891_v25 = vadd.f32 %v1883_v44, %v3136_v63 }
0x17ef   :  { %1936 = vrot.lane.b32.xlu1 %v2072_v6, %s2364_s14 }
0x17f0   :  { %v1899_v53 = vsub.f32 %v1891_v25, %v2990_v38 }
0x17f2   :  { %v2073_v59 = vadd.f32 -0.53062826, %v1899_v53 }
0x17f4   :  { %1938 = vrot.lane.b32.xlu2 %v2073_v59, %s2364_s14 }
0x17ff   :  { %v1927_v32 = vpop.permute.xlu2 %1926 }
0x1800   :  { %1950 = vst.msk [vmem:[%s3208_s3 + $0x8] sm:$0xff] %vm1948_vm1, %v1927_v32 }
0x1817   :  { %v1933_v34 = vpop.permute.xlu2 %1932 }
0x1818   :  { %1953 = vst.msk [vmem:[%s3208_s3 + $0x20] sm:$0xff] %vm1948_vm1, %v1933_v34 }
0x181c   :  { %v1929_v17 = vpop.permute.xlu0 %1928 }
0x181d   :  { %1951 = vst.msk [vmem:[%s3208_s3 + $0x10] sm:$0xff] %vm1948_vm1, %v1929_v17 }
0x1827   :  { %v1925_v38 = vpop.permute.xlu1 %1924 }
0x1828   :  { %1949 = vst.msk [vmem:[%s3208_s3] sm:$0xff] %vm1948_vm1, %v1925_v38 }
0x1830   :  { %v1931_v63 = vpop.permute.xlu1 %1930 }
0x1831   :  { %1952 = vst.msk [vmem:[%s3208_s3 + $0x18] sm:$0xff] %vm1948_vm1, %v1931_v63 }
0x1833   :  { %v1935_v47 = vpop.permute.xlu0 %1934 }
0x1834   :  { %1954 = vst.msk [vmem:[%s3208_s3 + $0x28] sm:$0xff] %vm1948_vm1, %v1935_v47 }
0x184e   :  { %v1939_v48 = vpop.permute.xlu2 %1938 }
0x184f   :  { %1956 = vst.msk [vmem:[%s3208_s3 + $0x38] sm:$0xff] %vm1948_vm1, %v1939_v48 }
0x1861   :  { %v1937_v30 = vpop.permute.xlu1 %1936 }
0x1862   :  { %1955 = vst.msk [vmem:[%s3208_s3 + $0x30] sm:$0xff] %vm1948_vm1, %v1937_v30 }

</bundles_post_ra>
